<compile_context>
chip_gen: v5e
topology: v5e:2x2
jax: 0.10.0
libtpu: 0.0.40
codegen_flags: <defaults>
</compile_context>

<pallas_src>
import jax
import jax.numpy as jnp
from jax import lax
from jax.experimental import pallas as pl
from jax.experimental.pallas import tpu as pltpu


_DEFAULT_TM = 512                 # rows per grid step
_VMEM_LIMIT = 48 * 1024 * 1024    # below v7x's 64 MiB physical VMEM; fine on v5e/v6e too


# ----------------------------------------------------------------------------
# Generic kernel: sum_i (lhs_i @ w_i) + bias, optional LeakyReLU, f32 accumulate.
# lhs_i blocks: (TM, K_i) bf16; w_i: (K_i, Cout) bf16 (whole, VMEM-resident); bias: (1, Cout) f32.
# ----------------------------------------------------------------------------
def _mm_bias_act_kernel_factory(n_lhs, slope):
    def kernel(*refs):
        lhs_refs = refs[:n_lhs]
        w_refs = refs[n_lhs:2 * n_lhs]
        b_ref = refs[2 * n_lhs]
        o_ref = refs[2 * n_lhs + 1]

        acc = jnp.dot(lhs_refs[0][...], w_refs[0][...],
                      preferred_element_type=jnp.float32)
        for i in range(1, n_lhs):
            acc = acc + jnp.dot(lhs_refs[i][...], w_refs[i][...],
                                preferred_element_type=jnp.float32)
        acc = acc + b_ref[...].astype(jnp.float32)
        if slope is not None:
            acc = jnp.maximum(acc, slope * acc)  # LeakyReLU, valid for 0 <= slope <= 1
        o_ref[...] = acc.astype(o_ref.dtype)
    return kernel


def _matmul_bias_act(lhs_list, w_list, b, *, slope, out_dtype, tm=_DEFAULT_TM):
    """Row-tiled, pipelined  sum_i lhs_i @ w_i + b  (+ LeakyReLU)."""
    M = lhs_list[0].shape[0]
    n_out = w_list[0].shape[1]

    # Cast first (halves the copy), then pad M up to a tile multiple only if needed.
    lhs_list = [x.astype(jnp.bfloat16) for x in lhs_list]
    Mp = ((M + tm - 1) // tm) * tm
    if Mp != M:
        lhs_list = [jnp.pad(x, ((0, Mp - M), (0, 0))) for x in lhs_list]
    w_list = [w.astype(jnp.bfloat16) for w in w_list]
    b2 = b.reshape(1, n_out).astype(jnp.float32)

    in_specs = (
        [pl.BlockSpec((tm, x.shape[1]), lambda i: (i, 0)) for x in lhs_list]
        + [pl.BlockSpec(w.shape, lambda i: (0, 0)) for w in w_list]  # resident across grid
        + [pl.BlockSpec((1, n_out), lambda i: (0, 0))]
    )

    out = pl.pallas_call(
        _mm_bias_act_kernel_factory(len(lhs_list), slope),
        out_shape=jax.ShapeDtypeStruct((Mp, n_out), out_dtype),
        grid=(Mp // tm,),
        in_specs=in_specs,
        out_specs=pl.BlockSpec((tm, n_out), lambda i: (i, 0)),
        compiler_params=pltpu.CompilerParams(
            dimension_semantics=("parallel",),
            vmem_limit_bytes=_VMEM_LIMIT,
        ),
    )(*lhs_list, *w_list, b2)
    return out[:M] if Mp != M else out


# ----------------------------------------------------------------------------
# Layout helpers (wrapper-side XLA glue; fused by XLA into the surrounding copies).
# ----------------------------------------------------------------------------
def _im2col_3x3(x_nhwc):
    """(N, H, W, C) -> (N*H*W, 9*C) patches for a 3x3 / pad=1 conv; column order (kh, kw, c)."""
    N, H, W, C = x_nhwc.shape
    xp = jnp.pad(x_nhwc, ((0, 0), (1, 1), (1, 1), (0, 0)))
    cols = [xp[:, kh:kh + H, kw:kw + W, :] for kh in range(3) for kw in range(3)]
    patches = jnp.stack(cols, axis=3)              # (N, H, W, 9, C)
    return patches.reshape(N * H * W, 9 * C)


def _conv3x3_w_to_mat(w):
    """PyTorch (Cout, Cin, 3, 3) -> (9*Cin, Cout), rows ordered (kh, kw, cin)."""
    Cout, Cin = w.shape[0], w.shape[1]
    return jnp.transpose(w, (2, 3, 1, 0)).reshape(9 * Cin, Cout)


# ----------------------------------------------------------------------------
# ConvTranspose2d(kernel=2, stride=2): per-pixel matmul (M, Cin) @ (Cin, 4*Cout),
# spatial un-shuffle done in bf16 in the wrapper.
# ----------------------------------------------------------------------------
def conv_transpose_2x2_s2(x_nhwc, w, b, *, tm=_DEFAULT_TM):
    # x_nhwc: (N, H, W, Cin); w: (Cin, Cout, 2, 2) [PyTorch ConvTranspose2d layout]; b: (Cout,)
    N, H, W, Cin = x_nhwc.shape
    Cout = w.shape[1]
    x2 = x_nhwc.reshape(N * H * W, Cin)
    w2 = jnp.transpose(w, (0, 2, 3, 1)).reshape(Cin, 4 * Cout)   # columns ordered (ki, kj, co)
    b2 = jnp.tile(b, 4)

    out = _matmul_bias_act([x2], [w2], b2, slope=None, out_dtype=jnp.bfloat16, tm=tm)

    out = out.reshape(N, H, W, 2, 2, Cout)           # (N, H, W, ki, kj, Cout), bf16
    out = jnp.transpose(out, (0, 1, 3, 2, 4, 5))     # (N, H, ki, W, kj, Cout)
    return out.reshape(N, 2 * H, 2 * W, Cout)


# ----------------------------------------------------------------------------
# UNetUpBlock forward (NCHW interface, same as PyTorch)
# ----------------------------------------------------------------------------
def unet_up_block(x_nchw, bridge_nchw, params, relu_slope, *, tm=_DEFAULT_TM):
    # cast to bf16 at the boundary so all layout plumbing moves half the bytes
    x = jnp.transpose(x_nchw, (0, 2, 3, 1)).astype(jnp.bfloat16)
    bridge = jnp.transpose(bridge_nchw, (0, 2, 3, 1)).astype(jnp.bfloat16)

    # 1) upsample: ConvTranspose2d(k=2, s=2) + bias
    up = conv_transpose_2x2_s2(x, params["up_w"], params["up_b"], tm=tm)  # (N, 2H, 2W, C_up) bf16
    N, H2, W2, C_up = up.shape

    # 2) fused concat + Conv3x3 + LeakyReLU:
    #    patches of `up` and `bridge` are separate matmul operands; conv1 weight split along Cin.
    pa = _im2col_3x3(up)                              # (M, 9*C_up)      bf16
    pb = _im2col_3x3(bridge)                          # (M, 9*C_bridge)  bf16
    w1a = _conv3x3_w_to_mat(params["c1_w"][:, :C_up])
    w1b = _conv3x3_w_to_mat(params["c1_w"][:, C_up:])
    h1 = _matmul_bias_act([pa, pb], [w1a, w1b], params["c1_b"],
                          slope=relu_slope, out_dtype=jnp.bfloat16, tm=tm)
    h1_nhwc = h1.reshape(N, H2, W2, -1)

    # 3) Conv3x3 + LeakyReLU
    p2 = _im2col_3x3(h1_nhwc)                         # (M, 9*Cout) bf16
    w2m = _conv3x3_w_to_mat(params["c2_w"])
    out = _matmul_bias_act([p2], [w2m], params["c2_b"],
                           slope=relu_slope, out_dtype=jnp.float32, tm=tm)
    out_nhwc = out.reshape(N, H2, W2, -1)

    return jnp.transpose(out_nhwc, (0, 3, 1, 2))


# ----------------------------------------------------------------------------
# Pure-JAX f32 reference for verification
# ----------------------------------------------------------------------------
def _ref_forward(x, bridge, params, slope):
    N, Cin, H, W = x.shape
    Cout = params["up_w"].shape[1]
    t = jnp.einsum("nchw,coij->nohiwj", x, params["up_w"])           # (N, Cout, H, 2, W, 2)
    up = t.reshape(N, Cout, 2 * H, 2 * W) + params["up_b"][None, :, None, None]
    out = jnp.concatenate([up, bridge], axis=1)

    def conv_lrelu(y, w, b):
        y = lax.conv_general_dilated(
            y, w, window_strides=(1, 1), padding=((1, 1), (1, 1)),
            dimension_numbers=("NCHW", "OIHW", "NCHW"),
        ) + b[None, :, None, None]
        return jnp.where(y >= 0, y, slope * y)

    out = conv_lrelu(out, params["c1_w"], params["c1_b"])
    out = conv_lrelu(out, params["c2_w"], params["c2_b"])
    return out


if __name__ == "__main__":
    key = jax.random.PRNGKey(0)
    ks = jax.random.split(key, 8)

    # Module config: in_size = 8, out_size = 4 (cat(up, bridge) has in_size channels)
    N, in_size, out_size = 2, 8, 4
    H = W = 16                     # x spatial; bridge / output spatial = 32
    relu_slope = 0.2

    x = jax.random.normal(ks[0], (N, in_size, H, W), jnp.float32)
    bridge = jax.random.normal(ks[1], (N, out_size, 2 * H, 2 * W), jnp.float32)

    params = {
        # ConvTranspose2d(in_size, out_size, 2, 2, bias=True): weight (Cin, Cout, 2, 2)
        "up_w": 0.1 * jax.random.normal(ks[2], (in_size, out_size, 2, 2), jnp.float32),
        "up_b": 0.1 * jax.random.normal(ks[3], (out_size,), jnp.float32),
        # Conv2d(in_size, out_size, 3, pad=1, bias=True): weight (Cout, Cin, 3, 3)
        "c1_w": 0.1 * jax.random.normal(ks[4], (out_size, in_size, 3, 3), jnp.float32),
        "c1_b": 0.1 * jax.random.normal(ks[5], (out_size,), jnp.float32),
        # Conv2d(out_size, out_size, 3, pad=1, bias=True)
        "c2_w": 0.1 * jax.random.normal(ks[6], (out_size, out_size, 3, 3), jnp.float32),
        "c2_b": 0.1 * jax.random.normal(ks[7], (out_size,), jnp.float32),
    }

    fwd = jax.jit(lambda a, b: unet_up_block(a, b, params, relu_slope))
    out = jax.block_until_ready(fwd(x, bridge))

    ref = _ref_forward(x, bridge, params, relu_slope)
    assert out.shape == (N, out_size, 2 * H, 2 * W), out.shape
    max_err = float(jnp.abs(out - ref).max())
    # bf16 MXU operands with f32 accumulation -> loosen tolerance vs the pure-f32 reference.
    assert jnp.allclose(out, ref, atol=5e-2, rtol=5e-2), max_err

    print("KERNEL_OK")
</pallas_src>

<mosaic_0001>
module attributes {stable_mosaic.version = 11 : i64} {
  func.func @kernel(%arg0: i32, %arg1: memref<512x8xbf16, #tpu.memory_space<vmem>>, %arg2: memref<8x16xbf16, #tpu.memory_space<vmem>>, %arg3: memref<1x16xf32, #tpu.memory_space<vmem>>, %arg4: memref<512x16xbf16, #tpu.memory_space<vmem>>) attributes {dimension_semantics = [#tpu.dimension_semantics<parallel>], iteration_bounds = array<i64: 1>, scalar_prefetch = 0 : i64, scratch_operands = 0 : i64, tpu.core_type = #tpu.core_type<tc>, window_params = [{transform_indices = @transform_0, window_bounds = array<i64: 512, 8>}, {pipeline_mode = #tpu.pipeline_mode<synchronous>, transform_indices = @transform_1, window_bounds = array<i64: 8, 16>}, {pipeline_mode = #tpu.pipeline_mode<synchronous>, transform_indices = @transform_2, window_bounds = array<i64: 1, 16>}, {transform_indices = @transform_3, window_bounds = array<i64: 512, 16>}]} {
    %c0 = arith.constant 0 : index
    %c0_0 = arith.constant 0 : index
    %0 = vector.load %arg1[%c0, %c0_0] : memref<512x8xbf16, #tpu.memory_space<vmem>>, vector<512x8xbf16>
    %c0_1 = arith.constant 0 : index
    %c0_2 = arith.constant 0 : index
    %1 = vector.load %arg2[%c0_1, %c0_2] : memref<8x16xbf16, #tpu.memory_space<vmem>>, vector<8x16xbf16>
    %cst = arith.constant dense<0.000000e+00> : vector<512x16xf32>
    %2 = tpu.matmul %0, %1, %cst {dimension_numbers = #tpu.dot_dimension_numbers<[1], [0], [0], [1], [0, 0, 1, 1], [], []>} : vector<512x8xbf16>, vector<8x16xbf16>, vector<512x16xf32> -> vector<512x16xf32>
    %c0_3 = arith.constant 0 : index
    %c0_4 = arith.constant 0 : index
    %3 = vector.load %arg3[%c0_3, %c0_4] : memref<1x16xf32, #tpu.memory_space<vmem>>, vector<1x16xf32>
    %4 = vector.broadcast %3 : vector<1x16xf32> to vector<512x16xf32>
    %5 = arith.addf %2, %4 : vector<512x16xf32>
    %6 = arith.truncf %5 : vector<512x16xf32> to vector<512x16xbf16>
    %c0_5 = arith.constant 0 : index
    %c0_6 = arith.constant 0 : index
    %7 = vector.load %arg4[%c0_5, %c0_6] : memref<512x16xbf16, #tpu.memory_space<vmem>>, vector<512x16xbf16>
    tpu.vector_store %arg4[%c0_5, %c0_6], %6 {strides = array<i32>} : memref<512x16xbf16, #tpu.memory_space<vmem>>, vector<512x16xbf16>,
    return
  }
  func.func @transform_0(%arg0: i32) -> (i32, i32) {
    %c0_i32 = arith.constant 0 : i32
    %c0_i32_0 = arith.constant 0 : i32
    return %arg0, %c0_i32 : i32, i32
  }
  func.func @transform_1(%arg0: i32) -> (i32, i32) {
    %c0_i32 = arith.constant 0 : i32
    %c0_i32_0 = arith.constant 0 : i32
    %c0_i32_1 = arith.constant 0 : i32
    return %c0_i32, %c0_i32_0 : i32, i32
  }
  func.func @transform_2(%arg0: i32) -> (i32, i32) {
    %c0_i32 = arith.constant 0 : i32
    %c0_i32_0 = arith.constant 0 : i32
    %c0_i32_1 = arith.constant 0 : i32
    return %c0_i32, %c0_i32_0 : i32, i32
  }
  func.func @transform_3(%arg0: i32) -> (i32, i32) {
    %c0_i32 = arith.constant 0 : i32
    %c0_i32_0 = arith.constant 0 : i32
    return %arg0, %c0_i32 : i32, i32
  }
}

module attributes {stable_mosaic.version = 11 : i64} {
  func.func @kernel(%arg0: i32, %arg1: memref<512x36xbf16, #tpu.memory_space<vmem>>, %arg2: memref<512x36xbf16, #tpu.memory_space<vmem>>, %arg3: memref<36x4xbf16, #tpu.memory_space<vmem>>, %arg4: memref<36x4xbf16, #tpu.memory_space<vmem>>, %arg5: memref<1x4xf32, #tpu.memory_space<vmem>>, %arg6: memref<512x4xbf16, #tpu.memory_space<vmem>>) attributes {dimension_semantics = [#tpu.dimension_semantics<parallel>], iteration_bounds = array<i64: 4>, scalar_prefetch = 0 : i64, scratch_operands = 0 : i64, tpu.core_type = #tpu.core_type<tc>, window_params = [{transform_indices = @transform_0, window_bounds = array<i64: 512, 36>}, {transform_indices = @transform_1, window_bounds = array<i64: 512, 36>}, {pipeline_mode = #tpu.pipeline_mode<synchronous>, transform_indices = @transform_2, window_bounds = array<i64: 36, 4>}, {pipeline_mode = #tpu.pipeline_mode<synchronous>, transform_indices = @transform_3, window_bounds = array<i64: 36, 4>}, {pipeline_mode = #tpu.pipeline_mode<synchronous>, transform_indices = @transform_4, window_bounds = array<i64: 1, 4>}, {transform_indices = @transform_5, window_bounds = array<i64: 512, 4>}]} {
    %c0 = arith.constant 0 : index
    %c0_0 = arith.constant 0 : index
    %0 = vector.load %arg1[%c0, %c0_0] : memref<512x36xbf16, #tpu.memory_space<vmem>>, vector<512x36xbf16>
    %c0_1 = arith.constant 0 : index
    %c0_2 = arith.constant 0 : index
    %1 = vector.load %arg3[%c0_1, %c0_2] : memref<36x4xbf16, #tpu.memory_space<vmem>>, vector<36x4xbf16>
    %cst = arith.constant dense<0.000000e+00> : vector<512x4xf32>
    %2 = tpu.matmul %0, %1, %cst {dimension_numbers = #tpu.dot_dimension_numbers<[1], [0], [0], [1], [0, 0, 1, 1], [], []>} : vector<512x36xbf16>, vector<36x4xbf16>, vector<512x4xf32> -> vector<512x4xf32>
    %c0_3 = arith.constant 0 : index
    %c0_4 = arith.constant 0 : index
    %3 = vector.load %arg2[%c0_3, %c0_4] : memref<512x36xbf16, #tpu.memory_space<vmem>>, vector<512x36xbf16>
    %c0_5 = arith.constant 0 : index
    %c0_6 = arith.constant 0 : index
    %4 = vector.load %arg4[%c0_5, %c0_6] : memref<36x4xbf16, #tpu.memory_space<vmem>>, vector<36x4xbf16>
    %cst_7 = arith.constant dense<0.000000e+00> : vector<512x4xf32>
    %5 = tpu.matmul %3, %4, %cst_7 {dimension_numbers = #tpu.dot_dimension_numbers<[1], [0], [0], [1], [0, 0, 1, 1], [], []>} : vector<512x36xbf16>, vector<36x4xbf16>, vector<512x4xf32> -> vector<512x4xf32>
    %6 = arith.addf %2, %5 : vector<512x4xf32>
    %c0_8 = arith.constant 0 : index
    %c0_9 = arith.constant 0 : index
    %7 = vector.load %arg5[%c0_8, %c0_9] : memref<1x4xf32, #tpu.memory_space<vmem>>, vector<1x4xf32>
    %8 = vector.broadcast %7 : vector<1x4xf32> to vector<512x4xf32>
    %9 = arith.addf %6, %8 : vector<512x4xf32>
    %cst_10 = arith.constant 2.000000e-01 : f32
    %10 = vector.broadcast %cst_10 : f32 to vector<512x4xf32>
    %11 = arith.mulf %10, %9 : vector<512x4xf32>
    %12 = arith.maximumf %9, %11 : vector<512x4xf32>
    %13 = arith.truncf %12 : vector<512x4xf32> to vector<512x4xbf16>
    %c0_11 = arith.constant 0 : index
    %c0_12 = arith.constant 0 : index
    %14 = vector.load %arg6[%c0_11, %c0_12] : memref<512x4xbf16, #tpu.memory_space<vmem>>, vector<512x4xbf16>
    tpu.vector_store %arg6[%c0_11, %c0_12], %13 {strides = array<i32>} : memref<512x4xbf16, #tpu.memory_space<vmem>>, vector<512x4xbf16>,
    return
  }
  func.func @transform_0(%arg0: i32) -> (i32, i32) {
    %c0_i32 = arith.constant 0 : i32
    %c0_i32_0 = arith.constant 0 : i32
    return %arg0, %c0_i32 : i32, i32
  }
  func.func @transform_1(%arg0: i32) -> (i32, i32) {
    %c0_i32 = arith.constant 0 : i32
    %c0_i32_0 = arith.constant 0 : i32
    return %arg0, %c0_i32 : i32, i32
  }
  func.func @transform_2(%arg0: i32) -> (i32, i32) {
    %c0_i32 = arith.constant 0 : i32
    %c0_i32_0 = arith.constant 0 : i32
    %c0_i32_1 = arith.constant 0 : i32
    return %c0_i32, %c0_i32_0 : i32, i32
  }
  func.func @transform_3(%arg0: i32) -> (i32, i32) {
    %c0_i32 = arith.constant 0 : i32
    %c0_i32_0 = arith.constant 0 : i32
    %c0_i32_1 = arith.constant 0 : i32
    return %c0_i32, %c0_i32_0 : i32, i32
  }
  func.func @transform_4(%arg0: i32) -> (i32, i32) {
    %c0_i32 = arith.constant 0 : i32
    %c0_i32_0 = arith.constant 0 : i32
    %c0_i32_1 = arith.constant 0 : i32
    return %c0_i32, %c0_i32_0 : i32, i32
  }
  func.func @transform_5(%arg0: i32) -> (i32, i32) {
    %c0_i32 = arith.constant 0 : i32
    %c0_i32_0 = arith.constant 0 : i32
    return %arg0, %c0_i32 : i32, i32
  }
}

module attributes {stable_mosaic.version = 11 : i64} {
  func.func @kernel(%arg0: i32, %arg1: memref<512x36xbf16, #tpu.memory_space<vmem>>, %arg2: memref<36x4xbf16, #tpu.memory_space<vmem>>, %arg3: memref<1x4xf32, #tpu.memory_space<vmem>>, %arg4: memref<512x4xf32, #tpu.memory_space<vmem>>) attributes {dimension_semantics = [#tpu.dimension_semantics<parallel>], iteration_bounds = array<i64: 4>, scalar_prefetch = 0 : i64, scratch_operands = 0 : i64, tpu.core_type = #tpu.core_type<tc>, window_params = [{transform_indices = @transform_0, window_bounds = array<i64: 512, 36>}, {pipeline_mode = #tpu.pipeline_mode<synchronous>, transform_indices = @transform_1, window_bounds = array<i64: 36, 4>}, {pipeline_mode = #tpu.pipeline_mode<synchronous>, transform_indices = @transform_2, window_bounds = array<i64: 1, 4>}, {transform_indices = @transform_3, window_bounds = array<i64: 512, 4>}]} {
    %c0 = arith.constant 0 : index
    %c0_0 = arith.constant 0 : index
    %0 = vector.load %arg1[%c0, %c0_0] : memref<512x36xbf16, #tpu.memory_space<vmem>>, vector<512x36xbf16>
    %c0_1 = arith.constant 0 : index
    %c0_2 = arith.constant 0 : index
    %1 = vector.load %arg2[%c0_1, %c0_2] : memref<36x4xbf16, #tpu.memory_space<vmem>>, vector<36x4xbf16>
    %cst = arith.constant dense<0.000000e+00> : vector<512x4xf32>
    %2 = tpu.matmul %0, %1, %cst {dimension_numbers = #tpu.dot_dimension_numbers<[1], [0], [0], [1], [0, 0, 1, 1], [], []>} : vector<512x36xbf16>, vector<36x4xbf16>, vector<512x4xf32> -> vector<512x4xf32>
    %c0_3 = arith.constant 0 : index
    %c0_4 = arith.constant 0 : index
    %3 = vector.load %arg3[%c0_3, %c0_4] : memref<1x4xf32, #tpu.memory_space<vmem>>, vector<1x4xf32>
    %4 = vector.broadcast %3 : vector<1x4xf32> to vector<512x4xf32>
    %5 = arith.addf %2, %4 : vector<512x4xf32>
    %cst_5 = arith.constant 2.000000e-01 : f32
    %6 = vector.broadcast %cst_5 : f32 to vector<512x4xf32>
    %7 = arith.mulf %6, %5 : vector<512x4xf32>
    %8 = arith.maximumf %5, %7 : vector<512x4xf32>
    %c0_6 = arith.constant 0 : index
    %c0_7 = arith.constant 0 : index
    %9 = vector.load %arg4[%c0_6, %c0_7] : memref<512x4xf32, #tpu.memory_space<vmem>>, vector<512x4xf32>
    tpu.vector_store %arg4[%c0_6, %c0_7], %8 {strides = array<i32>} : memref<512x4xf32, #tpu.memory_space<vmem>>, vector<512x4xf32>,
    return
  }
  func.func @transform_0(%arg0: i32) -> (i32, i32) {
    %c0_i32 = arith.constant 0 : i32
    %c0_i32_0 = arith.constant 0 : i32
    return %arg0, %c0_i32 : i32, i32
  }
  func.func @transform_1(%arg0: i32) -> (i32, i32) {
    %c0_i32 = arith.constant 0 : i32
    %c0_i32_0 = arith.constant 0 : i32
    %c0_i32_1 = arith.constant 0 : i32
    return %c0_i32, %c0_i32_0 : i32, i32
  }
  func.func @transform_2(%arg0: i32) -> (i32, i32) {
    %c0_i32 = arith.constant 0 : i32
    %c0_i32_0 = arith.constant 0 : i32
    %c0_i32_1 = arith.constant 0 : i32
    return %c0_i32, %c0_i32_0 : i32, i32
  }
  func.func @transform_3(%arg0: i32) -> (i32, i32) {
    %c0_i32 = arith.constant 0 : i32
    %c0_i32_0 = arith.constant 0 : i32
    return %arg0, %c0_i32 : i32, i32
  }
}

</mosaic_0001>

<bundles_post_ra>
// kernel: tile.7
= control target key start
LH: loop header
LB: loop body
LE: loop exit
PB: predicated region body
PF: predicated region fallthrough
CT: control target
= control target key end

     0   :  { %s37_s8 = smov 4   ;;  %s38_s9 = smov 8   ;;  %vm7_vm0 = vcmask 31744   ;;  %vm13_vm1 = vcmask 130144   ;;  %vm19_vm2 = vcmask 97344   ;;  %vm25_vm3 = vcmask 64544   ;;  %s55_s0 = inlined_call_operand.vmem [shape: f32[4,4], index: 0, kind: input, shape index: {}]   ;;  %s56_s1 = inlined_call_operand.vmem [shape: f32[1,16], index: 1, kind: output, shape index: {}]  }
   0x1   :  { %v4_v0 = vld [vmem:[%s55_s0] sm:$0xf]  ;;  %s36_s0 = smov 12  }
   0x2   :  { %5 = vst [vmem:[#allocation1] sm:$0xf] %v4_v0 }
   0x9   :  { %v10_v1 = vld [vmem:[#allocation1 + $0x3] sm:$0x1]   ;;  %v22_v2 = vld [vmem:[#allocation1 + $0x1] sm:$0x1]   ;;  %v16_v3 = vld [vmem:[#allocation1 + $0x2] sm:$0x1]  }
   0xa   :  { %11 = vrot.lane.b32.xlu0 %v10_v1, %s36_s0  ;;  %23 = vrot.lane.b32.xlu1 %v22_v2, %s37_s8  ;;  %v6_v4 = vld [vmem:[#allocation1] sm:$0x1]  }
   0xb   :  { %8 = vst.msk [vmem:[#allocation0] sm:$0x1] %vm7_vm0, %v6_v4  }
  0x12   :  { %17 = vrot.lane.b32.xlu0 %v16_v3, %s38_s9 }
  0x7c   :  { %v12_v5 = vpop.permute.xlu0 %11   ;;  %v24_v6 = vpop.permute.xlu1 %23  }
  0x7d   :  { %14 = vst.msk [vmem:[#allocation0] sm:$0x1] %vm13_vm1, %v12_v5  }
  0x84   :  { %v18_v7 = vpop.permute.xlu0 %17  }
  0x85   :  { %20 = vst.msk [vmem:[#allocation0] sm:$0x1] %vm19_vm2, %v18_v7  }
  0x86   :  { %26 = vst.msk [vmem:[#allocation0] sm:$0x1] %vm25_vm3, %v24_v6  }
  0x8d   :  { %v29_v8 = vld [vmem:[#allocation0] sm:$0x1] }
  0x8e   :  { %32 = vst [vmem:[%s56_s1] sm:$0x1] %v29_v8 }

// kernel: tile.6
= control target key start
LH: loop header
LB: loop body
LE: loop exit
PB: predicated region body
PF: predicated region fallthrough
CT: control target
= control target key end

     0   :  { %2 = vsyncpa [#allocation1], 0  ;;  %s48_s8 = smov [#allocation0]   ;;  %s65_s0 = inlined_call_operand.hbm [shape: f32[4], index: 0, kind: input, shape index: {}]   ;;  %s66_s1 = inlined_call_operand.vmem [shape: f32[4,4], index: 1, kind: output, shape index: {}]  }
   0x1   :  { %s8_s0 = sshll.u32 %s65_s0, 4  ;;  %s10_s9 = sshll.u32 %s48_s8, 4  ;;  %s9_s0 = int_to_ptr.hbm [resolvable:$true] %s8_s0  ;;  %s11_s9 = int_to_ptr.vmem [resolvable:$true] %s10_s9 }
   0x2   :  { %13 = dma.hbm_to_vmem [thread:$0]  %s9_s0, 16, %s11_s9, [#allocation1]  }
   0x3   :  { %46 = dma.done.wait [#allocation1], 16  }
   0x4   :  { %47 = vsyncadd [#allocation1], 4294967280  ;;  %v18_v0 = vld [vmem:[#allocation0] ss:$0 sm:$0xff] }
   0x5   :  { %19 = vst [vmem:[%s66_s1] sm:$0xf] %v18_v0 }
   0x6   :  { %20 = vsyncpa [#allocation1], 1 }

// kernel: _lambda_.3
= control target key start
LH: loop header
LB: loop body
LE: loop exit
PB: predicated region body
PF: predicated region fallthrough
CT: control target
= control target key end

     0   :  { %8 = vsyncpa [#allocation3], 0  ;;  %s885_s15 = smov [#allocation2]   ;;  %s1362_s0 = inlined_call_operand.vmem [shape: bf16[512,8], index: 0, kind: input, shape index: {}]   ;;  %s1363_s1 = inlined_call_operand.hbm [shape: bf16[8,16], index: 1, kind: input, shape index: {}]   ;;  %s1364_s2 = inlined_call_operand.vmem [shape: f32[1,16], index: 2, kind: input, shape index: {}]   ;;  %s1365_s3 = inlined_call_operand.vmem [shape: bf16[512,16], index: 3, kind: output, shape index: {}]  }
   0x1   :  { %s16_s14 = sshll.u32 %s1363_s1, 4  ;;  %s18_s16 = sshll.u32 %s885_s15, 4  ;;  %s17_s14 = int_to_ptr.hbm [resolvable:$true] %s16_s14  ;;  %s19_s16 = int_to_ptr.vmem [resolvable:$true] %s18_s16 }
   0x2   :  { %21 = dma.hbm_to_vmem [thread:$0]  %s17_s14, 64, %s19_s16, [#allocation3]  }
   0x3   :  { %883 = dma.done.wait [#allocation3], 64  }
   0x4   :  { %884 = vsyncadd [#allocation3], 4294967232  ;;  %vm355_vm0 = vcmask 1043456   ;;  %v93_v0 = vld [vmem:[#allocation2] sm:$0xf]  ;;  %vm258_vm1 = vcmask 64512  }
   0x5   :  { %v357_v1 = vsel %vm355_vm0, %v93_v0, 0  ;;  %v822_v2 = vld [vmem:[%s1362_s0] sm:$0xff]  ;;  %v823_v6 = vld [vmem:[%s1362_s0 + $0x8] sm:$0xff]  ;;  %v824_v10 = vld [vmem:[%s1362_s0 + $0x10] sm:$0xff]  ;;  %vm592_vm2 = vcmask 125952  }
   0x6   :  { %v830_v3 = vld [vmem:[%s1362_s0 + $0x40] sm:$0xff]  ;;  %366 = vmatpush.bf16.msra.mxu0 %v357_v1  ;;  %854 = vmatpush.bf16.msra.mxu1 %v357_v1  ;;  %v831_v7 = vld [vmem:[%s1362_s0 + $0x48] sm:$0xff]  ;;  %v832_v11 = vld [vmem:[%s1362_s0 + $0x50] sm:$0xff] }
   0x7   :  { %v838_v4 = vld [vmem:[%s1362_s0 + $0x80] sm:$0xff]  ;;  %855 = vmatpush.bf16.msra.mxu2 %v357_v1  ;;  %856 = vmatpush.bf16.msra.mxu3 %v357_v1  ;;  %v839_v8 = vld [vmem:[%s1362_s0 + $0x88] sm:$0xff]  ;;  %v840_v12 = vld [vmem:[%s1362_s0 + $0x90] sm:$0xff] }
   0x8   :  { %v846_v5 = vld [vmem:[%s1362_s0 + $0xc0] sm:$0xff]  ;;  %v847_v9 = vld [vmem:[%s1362_s0 + $0xc8] sm:$0xff]  ;;  %v848_v13 = vld [vmem:[%s1362_s0 + $0xd0] sm:$0xff] }
   0x9   :  { %790 = vmatmul.msk.bf16.vlgmr.msra.gmra.mxu0 %vm258_vm1, %v822_v2  ;;  %798 = vmatmul.msk.bf16.vlgmr.msra.gmra.mxu1 %vm258_vm1, %v830_v3  ;;  %v825_v14 = vld [vmem:[%s1362_s0 + $0x18] sm:$0xff]  ;;  %v826_v18 = vld [vmem:[%s1362_s0 + $0x20] sm:$0xff]  ;;  %v827_v22 = vld [vmem:[%s1362_s0 + $0x28] sm:$0xff] }
   0xa   :  { %806 = vmatmul.msk.bf16.vlgmr.msra.gmra.mxu2 %vm258_vm1, %v838_v4  ;;  %814 = vmatmul.msk.bf16.vlgmr.msra.gmra.mxu3 %vm258_vm1, %v846_v5  ;;  %v833_v15 = vld [vmem:[%s1362_s0 + $0x58] sm:$0xff]  ;;  %v834_v19 = vld [vmem:[%s1362_s0 + $0x60] sm:$0xff]  ;;  %v835_v23 = vld [vmem:[%s1362_s0 + $0x68] sm:$0xff] }
   0xb   :  { %v841_v16 = vld [vmem:[%s1362_s0 + $0x98] sm:$0xff]  ;;  %v842_v20 = vld [vmem:[%s1362_s0 + $0xa0] sm:$0xff]  ;;  %v843_v24 = vld [vmem:[%s1362_s0 + $0xa8] sm:$0xff] }
   0xc   :  { %v849_v17 = vld [vmem:[%s1362_s0 + $0xd8] sm:$0xff]  ;;  %v850_v21 = vld [vmem:[%s1362_s0 + $0xe0] sm:$0xff]  ;;  %v851_v25 = vld [vmem:[%s1362_s0 + $0xe8] sm:$0xff] }
   0xd   :  { %v828_v26 = vld [vmem:[%s1362_s0 + $0x30] sm:$0xff]  ;;  %v829_v30 = vld [vmem:[%s1362_s0 + $0x38] sm:$0xff]  ;;  %v1040_v34 = vld [vmem:[%s1364_s2] ss:$0 sm:$0xff] }
   0xe   :  { %v836_v27 = vld [vmem:[%s1362_s0 + $0x70] sm:$0xff]  ;;  %v837_v31 = vld [vmem:[%s1362_s0 + $0x78] sm:$0xff] }
   0xf   :  { %v844_v28 = vld [vmem:[%s1362_s0 + $0xb0] sm:$0xff]  ;;  %v845_v32 = vld [vmem:[%s1362_s0 + $0xb8] sm:$0xff] }
  0x10   :  { %v852_v29 = vld [vmem:[%s1362_s0 + $0xf0] sm:$0xff]  ;;  %v853_v33 = vld [vmem:[%s1362_s0 + $0xf8] sm:$0xff] }
  0x19   :  { %791 = vmatmul.msk.bf16.gmra.mxu0 %vm258_vm1, %v823_v6  ;;  %799 = vmatmul.msk.bf16.gmra.mxu1 %vm258_vm1, %v831_v7 }
  0x1a   :  { %807 = vmatmul.msk.bf16.gmra.mxu2 %vm258_vm1, %v839_v8  ;;  %815 = vmatmul.msk.bf16.gmra.mxu3 %vm258_vm1, %v847_v9 }
  0x29   :  { %792 = vmatmul.msk.bf16.gmra.mxu0 %vm258_vm1, %v824_v10  ;;  %800 = vmatmul.msk.bf16.gmra.mxu1 %vm258_vm1, %v832_v11 }
  0x2a   :  { %808 = vmatmul.msk.bf16.gmra.mxu2 %vm258_vm1, %v840_v12  ;;  %816 = vmatmul.msk.bf16.gmra.mxu3 %vm258_vm1, %v848_v13 }
  0x39   :  { %793 = vmatmul.msk.bf16.gmra.mxu0 %vm258_vm1, %v825_v14  ;;  %801 = vmatmul.msk.bf16.gmra.mxu1 %vm258_vm1, %v833_v15 }
  0x3a   :  { %809 = vmatmul.msk.bf16.gmra.mxu2 %vm258_vm1, %v841_v16  ;;  %817 = vmatmul.msk.bf16.gmra.mxu3 %vm258_vm1, %v849_v17 }
  0x49   :  { %794 = vmatmul.msk.bf16.gmra.mxu0 %vm258_vm1, %v826_v18  ;;  %802 = vmatmul.msk.bf16.gmra.mxu1 %vm258_vm1, %v834_v19 }
  0x4a   :  { %810 = vmatmul.msk.bf16.gmra.mxu2 %vm258_vm1, %v842_v20  ;;  %818 = vmatmul.msk.bf16.gmra.mxu3 %vm258_vm1, %v850_v21 }
  0x59   :  { %795 = vmatmul.msk.bf16.gmra.mxu0 %vm258_vm1, %v827_v22  ;;  %803 = vmatmul.msk.bf16.gmra.mxu1 %vm258_vm1, %v835_v23 }
  0x5a   :  { %811 = vmatmul.msk.bf16.gmra.mxu2 %vm258_vm1, %v843_v24  ;;  %819 = vmatmul.msk.bf16.gmra.mxu3 %vm258_vm1, %v851_v25 }
  0x69   :  { %796 = vmatmul.msk.bf16.gmra.mxu0 %vm258_vm1, %v828_v26  ;;  %804 = vmatmul.msk.bf16.gmra.mxu1 %vm258_vm1, %v836_v27 }
  0x6a   :  { %812 = vmatmul.msk.bf16.gmra.mxu2 %vm258_vm1, %v844_v28  ;;  %820 = vmatmul.msk.bf16.gmra.mxu3 %vm258_vm1, %v852_v29 }
  0x79   :  { %797 = vmatmul.msk.bf16.gmra.mxu0 %vm258_vm1, %v829_v30  ;;  %805 = vmatmul.msk.bf16.gmra.mxu1 %vm258_vm1, %v837_v31 }
  0x7a   :  { %813 = vmatmul.msk.bf16.gmra.mxu2 %vm258_vm1, %v845_v32  ;;  %821 = vmatmul.msk.bf16.gmra.mxu3 %vm258_vm1, %v853_v33 }
  0x86   :  { %v368_v35 = vpop.f32.mrf.mxu0  ;;  %v408_v36 = vpop.f32.mrf.mxu1 }
  0x87   :  { %v369_v37 = vadd.f32 %v1040_v34, %v368_v35  ;;  %v409_v38 = vadd.f32 %v1040_v34, %v408_v36 }
  0x89   :  { %v528_v39 = vpack.c.bf16 %v369_v37, %v369_v37  ;;  %v544_v40 = vpack.c.bf16 %v409_v38, %v409_v38 }
  0x8b   :  { %593 = vst.msk [vmem:[%s1365_s3] sm:$0xf] %vm592_vm2, %v528_v39 }
  0x8c   :  { %609 = vst.msk [vmem:[%s1365_s3 + $0x40] sm:$0xf] %vm592_vm2, %v544_v40 }
  0x8d   :  { %v448_v41 = vpop.f32.mrf.mxu2  ;;  %v488_v42 = vpop.f32.mrf.mxu3 }
  0x8e   :  { %v449_v43 = vadd.f32 %v1040_v34, %v448_v41  ;;  %v489_v44 = vadd.f32 %v1040_v34, %v488_v42  ;;  %v370_v45 = vpop.f32.mrf.mxu0  ;;  %v410_v46 = vpop.f32.mrf.mxu1 }
  0x8f   :  { %v371_v47 = vadd.f32 %v1040_v34, %v370_v45  ;;  %v411_v48 = vadd.f32 %v1040_v34, %v410_v46 }
  0x90   :  { %v560_v49 = vpack.c.bf16 %v449_v43, %v449_v43  ;;  %v576_v50 = vpack.c.bf16 %v489_v44, %v489_v44 }
  0x91   :  { %v529_v51 = vpack.c.bf16 %v371_v47, %v371_v47  ;;  %v545_v52 = vpack.c.bf16 %v411_v48, %v411_v48 }
  0x92   :  { %625 = vst.msk [vmem:[%s1365_s3 + $0x80] sm:$0xf] %vm592_vm2, %v560_v49 }
  0x93   :  { %641 = vst.msk [vmem:[%s1365_s3 + $0xc0] sm:$0xf] %vm592_vm2, %v576_v50 }
  0x94   :  { %594 = vst.msk [vmem:[%s1365_s3 + $0x4] sm:$0xf] %vm592_vm2, %v529_v51 }
  0x95   :  { %610 = vst.msk [vmem:[%s1365_s3 + $0x44] sm:$0xf] %vm592_vm2, %v545_v52  ;;  %v450_v53 = vpop.f32.mrf.mxu2  ;;  %v490_v54 = vpop.f32.mrf.mxu3 }
  0x96   :  { %v451_v55 = vadd.f32 %v1040_v34, %v450_v53  ;;  %v491_v56 = vadd.f32 %v1040_v34, %v490_v54  ;;  %v373_v57 = vpop.f32.mrf.mxu0  ;;  %v413_v58 = vpop.f32.mrf.mxu1 }
  0x97   :  { %v374_v59 = vadd.f32 %v1040_v34, %v373_v57  ;;  %v414_v60 = vadd.f32 %v1040_v34, %v413_v58 }
  0x98   :  { %v561_v61 = vpack.c.bf16 %v451_v55, %v451_v55  ;;  %v577_v62 = vpack.c.bf16 %v491_v56, %v491_v56 }
  0x99   :  { %v530_v63 = vpack.c.bf16 %v374_v59, %v374_v59  ;;  %v546_v0 = vpack.c.bf16 %v414_v60, %v414_v60 }
  0x9a   :  { %626 = vst.msk [vmem:[%s1365_s3 + $0x84] sm:$0xf] %vm592_vm2, %v561_v61 }
  0x9b   :  { %642 = vst.msk [vmem:[%s1365_s3 + $0xc4] sm:$0xf] %vm592_vm2, %v577_v62 }
  0x9c   :  { %595 = vst.msk [vmem:[%s1365_s3 + $0x8] sm:$0xf] %vm592_vm2, %v530_v63 }
  0x9d   :  { %611 = vst.msk [vmem:[%s1365_s3 + $0x48] sm:$0xf] %vm592_vm2, %v546_v0  ;;  %v453_v1 = vpop.f32.mrf.mxu2  ;;  %v493_v2 = vpop.f32.mrf.mxu3 }
  0x9e   :  { %v454_v3 = vadd.f32 %v1040_v34, %v453_v1  ;;  %v494_v4 = vadd.f32 %v1040_v34, %v493_v2  ;;  %v375_v5 = vpop.f32.mrf.mxu0  ;;  %v415_v6 = vpop.f32.mrf.mxu1 }
  0x9f   :  { %v376_v7 = vadd.f32 %v1040_v34, %v375_v5  ;;  %v416_v8 = vadd.f32 %v1040_v34, %v415_v6 }
  0xa0   :  { %v562_v9 = vpack.c.bf16 %v454_v3, %v454_v3  ;;  %v578_v10 = vpack.c.bf16 %v494_v4, %v494_v4 }
  0xa1   :  { %v531_v11 = vpack.c.bf16 %v376_v7, %v376_v7  ;;  %v547_v12 = vpack.c.bf16 %v416_v8, %v416_v8 }
  0xa2   :  { %627 = vst.msk [vmem:[%s1365_s3 + $0x88] sm:$0xf] %vm592_vm2, %v562_v9 }
  0xa3   :  { %643 = vst.msk [vmem:[%s1365_s3 + $0xc8] sm:$0xf] %vm592_vm2, %v578_v10 }
  0xa4   :  { %596 = vst.msk [vmem:[%s1365_s3 + $0xc] sm:$0xf] %vm592_vm2, %v531_v11 }
  0xa5   :  { %612 = vst.msk [vmem:[%s1365_s3 + $0x4c] sm:$0xf] %vm592_vm2, %v547_v12  ;;  %v455_v13 = vpop.f32.mrf.mxu2  ;;  %v495_v14 = vpop.f32.mrf.mxu3 }
  0xa6   :  { %v456_v15 = vadd.f32 %v1040_v34, %v455_v13  ;;  %v496_v16 = vadd.f32 %v1040_v34, %v495_v14  ;;  %v378_v17 = vpop.f32.mrf.mxu0  ;;  %v418_v18 = vpop.f32.mrf.mxu1 }
  0xa7   :  { %v379_v19 = vadd.f32 %v1040_v34, %v378_v17  ;;  %v419_v20 = vadd.f32 %v1040_v34, %v418_v18 }
  0xa8   :  { %v563_v21 = vpack.c.bf16 %v456_v15, %v456_v15  ;;  %v579_v22 = vpack.c.bf16 %v496_v16, %v496_v16 }
  0xa9   :  { %v532_v23 = vpack.c.bf16 %v379_v19, %v379_v19  ;;  %v548_v24 = vpack.c.bf16 %v419_v20, %v419_v20 }
  0xaa   :  { %628 = vst.msk [vmem:[%s1365_s3 + $0x8c] sm:$0xf] %vm592_vm2, %v563_v21 }
  0xab   :  { %644 = vst.msk [vmem:[%s1365_s3 + $0xcc] sm:$0xf] %vm592_vm2, %v579_v22 }
  0xac   :  { %597 = vst.msk [vmem:[%s1365_s3 + $0x10] sm:$0xf] %vm592_vm2, %v532_v23 }
  0xad   :  { %613 = vst.msk [vmem:[%s1365_s3 + $0x50] sm:$0xf] %vm592_vm2, %v548_v24  ;;  %v458_v25 = vpop.f32.mrf.mxu2  ;;  %v498_v26 = vpop.f32.mrf.mxu3 }
  0xae   :  { %v459_v27 = vadd.f32 %v1040_v34, %v458_v25  ;;  %v499_v28 = vadd.f32 %v1040_v34, %v498_v26  ;;  %v380_v29 = vpop.f32.mrf.mxu0  ;;  %v420_v30 = vpop.f32.mrf.mxu1 }
  0xaf   :  { %v381_v31 = vadd.f32 %v1040_v34, %v380_v29  ;;  %v421_v32 = vadd.f32 %v1040_v34, %v420_v30 }
  0xb0   :  { %v564_v33 = vpack.c.bf16 %v459_v27, %v459_v27  ;;  %v580_v35 = vpack.c.bf16 %v499_v28, %v499_v28 }
  0xb1   :  { %v533_v36 = vpack.c.bf16 %v381_v31, %v381_v31  ;;  %v549_v37 = vpack.c.bf16 %v421_v32, %v421_v32 }
  0xb2   :  { %629 = vst.msk [vmem:[%s1365_s3 + $0x90] sm:$0xf] %vm592_vm2, %v564_v33 }
  0xb3   :  { %645 = vst.msk [vmem:[%s1365_s3 + $0xd0] sm:$0xf] %vm592_vm2, %v580_v35 }
  0xb4   :  { %598 = vst.msk [vmem:[%s1365_s3 + $0x14] sm:$0xf] %vm592_vm2, %v533_v36 }
  0xb5   :  { %614 = vst.msk [vmem:[%s1365_s3 + $0x54] sm:$0xf] %vm592_vm2, %v549_v37  ;;  %v460_v38 = vpop.f32.mrf.mxu2  ;;  %v500_v39 = vpop.f32.mrf.mxu3 }
  0xb6   :  { %v461_v40 = vadd.f32 %v1040_v34, %v460_v38  ;;  %v501_v41 = vadd.f32 %v1040_v34, %v500_v39  ;;  %v383_v42 = vpop.f32.mrf.mxu0  ;;  %v423_v43 = vpop.f32.mrf.mxu1 }
  0xb7   :  { %v384_v44 = vadd.f32 %v1040_v34, %v383_v42  ;;  %v424_v45 = vadd.f32 %v1040_v34, %v423_v43 }
  0xb8   :  { %v565_v46 = vpack.c.bf16 %v461_v40, %v461_v40  ;;  %v581_v47 = vpack.c.bf16 %v501_v41, %v501_v41 }
  0xb9   :  { %v534_v48 = vpack.c.bf16 %v384_v44, %v384_v44  ;;  %v550_v49 = vpack.c.bf16 %v424_v45, %v424_v45 }
  0xba   :  { %630 = vst.msk [vmem:[%s1365_s3 + $0x94] sm:$0xf] %vm592_vm2, %v565_v46 }
  0xbb   :  { %646 = vst.msk [vmem:[%s1365_s3 + $0xd4] sm:$0xf] %vm592_vm2, %v581_v47 }
  0xbc   :  { %599 = vst.msk [vmem:[%s1365_s3 + $0x18] sm:$0xf] %vm592_vm2, %v534_v48 }
  0xbd   :  { %615 = vst.msk [vmem:[%s1365_s3 + $0x58] sm:$0xf] %vm592_vm2, %v550_v49  ;;  %v463_v50 = vpop.f32.mrf.mxu2  ;;  %v503_v51 = vpop.f32.mrf.mxu3 }
  0xbe   :  { %v464_v52 = vadd.f32 %v1040_v34, %v463_v50  ;;  %v504_v53 = vadd.f32 %v1040_v34, %v503_v51  ;;  %v385_v54 = vpop.f32.mrf.mxu0  ;;  %v425_v55 = vpop.f32.mrf.mxu1 }
  0xbf   :  { %v386_v56 = vadd.f32 %v1040_v34, %v385_v54  ;;  %v426_v57 = vadd.f32 %v1040_v34, %v425_v55 }
  0xc0   :  { %v566_v58 = vpack.c.bf16 %v464_v52, %v464_v52  ;;  %v582_v59 = vpack.c.bf16 %v504_v53, %v504_v53 }
  0xc1   :  { %v535_v60 = vpack.c.bf16 %v386_v56, %v386_v56  ;;  %v551_v61 = vpack.c.bf16 %v426_v57, %v426_v57 }
  0xc2   :  { %631 = vst.msk [vmem:[%s1365_s3 + $0x98] sm:$0xf] %vm592_vm2, %v566_v58 }
  0xc3   :  { %647 = vst.msk [vmem:[%s1365_s3 + $0xd8] sm:$0xf] %vm592_vm2, %v582_v59 }
  0xc4   :  { %600 = vst.msk [vmem:[%s1365_s3 + $0x1c] sm:$0xf] %vm592_vm2, %v535_v60 }
  0xc5   :  { %616 = vst.msk [vmem:[%s1365_s3 + $0x5c] sm:$0xf] %vm592_vm2, %v551_v61  ;;  %v465_v62 = vpop.f32.mrf.mxu2  ;;  %v505_v63 = vpop.f32.mrf.mxu3 }
  0xc6   :  { %v466_v0 = vadd.f32 %v1040_v34, %v465_v62  ;;  %v506_v1 = vadd.f32 %v1040_v34, %v505_v63  ;;  %v388_v2 = vpop.f32.mrf.mxu0  ;;  %v428_v3 = vpop.f32.mrf.mxu1 }
  0xc7   :  { %v389_v4 = vadd.f32 %v1040_v34, %v388_v2  ;;  %v429_v5 = vadd.f32 %v1040_v34, %v428_v3 }
  0xc8   :  { %v567_v6 = vpack.c.bf16 %v466_v0, %v466_v0  ;;  %v583_v7 = vpack.c.bf16 %v506_v1, %v506_v1 }
  0xc9   :  { %v536_v8 = vpack.c.bf16 %v389_v4, %v389_v4  ;;  %v552_v9 = vpack.c.bf16 %v429_v5, %v429_v5 }
  0xca   :  { %632 = vst.msk [vmem:[%s1365_s3 + $0x9c] sm:$0xf] %vm592_vm2, %v567_v6 }
  0xcb   :  { %648 = vst.msk [vmem:[%s1365_s3 + $0xdc] sm:$0xf] %vm592_vm2, %v583_v7 }
  0xcc   :  { %601 = vst.msk [vmem:[%s1365_s3 + $0x20] sm:$0xf] %vm592_vm2, %v536_v8 }
  0xcd   :  { %617 = vst.msk [vmem:[%s1365_s3 + $0x60] sm:$0xf] %vm592_vm2, %v552_v9  ;;  %v468_v10 = vpop.f32.mrf.mxu2  ;;  %v508_v11 = vpop.f32.mrf.mxu3 }
  0xce   :  { %v469_v12 = vadd.f32 %v1040_v34, %v468_v10  ;;  %v509_v13 = vadd.f32 %v1040_v34, %v508_v11  ;;  %v390_v14 = vpop.f32.mrf.mxu0  ;;  %v430_v15 = vpop.f32.mrf.mxu1 }
  0xcf   :  { %v391_v16 = vadd.f32 %v1040_v34, %v390_v14  ;;  %v431_v17 = vadd.f32 %v1040_v34, %v430_v15 }
  0xd0   :  { %v568_v18 = vpack.c.bf16 %v469_v12, %v469_v12  ;;  %v584_v19 = vpack.c.bf16 %v509_v13, %v509_v13 }
  0xd1   :  { %v537_v20 = vpack.c.bf16 %v391_v16, %v391_v16  ;;  %v553_v21 = vpack.c.bf16 %v431_v17, %v431_v17 }
  0xd2   :  { %633 = vst.msk [vmem:[%s1365_s3 + $0xa0] sm:$0xf] %vm592_vm2, %v568_v18 }
  0xd3   :  { %649 = vst.msk [vmem:[%s1365_s3 + $0xe0] sm:$0xf] %vm592_vm2, %v584_v19 }
  0xd4   :  { %602 = vst.msk [vmem:[%s1365_s3 + $0x24] sm:$0xf] %vm592_vm2, %v537_v20 }
  0xd5   :  { %618 = vst.msk [vmem:[%s1365_s3 + $0x64] sm:$0xf] %vm592_vm2, %v553_v21  ;;  %v470_v22 = vpop.f32.mrf.mxu2  ;;  %v510_v23 = vpop.f32.mrf.mxu3 }
  0xd6   :  { %v471_v24 = vadd.f32 %v1040_v34, %v470_v22  ;;  %v511_v25 = vadd.f32 %v1040_v34, %v510_v23  ;;  %v393_v26 = vpop.f32.mrf.mxu0  ;;  %v433_v27 = vpop.f32.mrf.mxu1 }
  0xd7   :  { %v394_v28 = vadd.f32 %v1040_v34, %v393_v26  ;;  %v434_v29 = vadd.f32 %v1040_v34, %v433_v27 }
  0xd8   :  { %v569_v30 = vpack.c.bf16 %v471_v24, %v471_v24  ;;  %v585_v31 = vpack.c.bf16 %v511_v25, %v511_v25 }
  0xd9   :  { %v538_v32 = vpack.c.bf16 %v394_v28, %v394_v28  ;;  %v554_v33 = vpack.c.bf16 %v434_v29, %v434_v29 }
  0xda   :  { %634 = vst.msk [vmem:[%s1365_s3 + $0xa4] sm:$0xf] %vm592_vm2, %v569_v30 }
  0xdb   :  { %650 = vst.msk [vmem:[%s1365_s3 + $0xe4] sm:$0xf] %vm592_vm2, %v585_v31 }
  0xdc   :  { %603 = vst.msk [vmem:[%s1365_s3 + $0x28] sm:$0xf] %vm592_vm2, %v538_v32 }
  0xdd   :  { %619 = vst.msk [vmem:[%s1365_s3 + $0x68] sm:$0xf] %vm592_vm2, %v554_v33  ;;  %v473_v35 = vpop.f32.mrf.mxu2  ;;  %v513_v36 = vpop.f32.mrf.mxu3 }
  0xde   :  { %v474_v37 = vadd.f32 %v1040_v34, %v473_v35  ;;  %v514_v38 = vadd.f32 %v1040_v34, %v513_v36  ;;  %v395_v39 = vpop.f32.mrf.mxu0  ;;  %v435_v40 = vpop.f32.mrf.mxu1 }
  0xdf   :  { %v396_v41 = vadd.f32 %v1040_v34, %v395_v39  ;;  %v436_v42 = vadd.f32 %v1040_v34, %v435_v40 }
  0xe0   :  { %v570_v43 = vpack.c.bf16 %v474_v37, %v474_v37  ;;  %v586_v44 = vpack.c.bf16 %v514_v38, %v514_v38 }
  0xe1   :  { %v539_v45 = vpack.c.bf16 %v396_v41, %v396_v41  ;;  %v555_v46 = vpack.c.bf16 %v436_v42, %v436_v42 }
  0xe2   :  { %635 = vst.msk [vmem:[%s1365_s3 + $0xa8] sm:$0xf] %vm592_vm2, %v570_v43 }
  0xe3   :  { %651 = vst.msk [vmem:[%s1365_s3 + $0xe8] sm:$0xf] %vm592_vm2, %v586_v44 }
  0xe4   :  { %604 = vst.msk [vmem:[%s1365_s3 + $0x2c] sm:$0xf] %vm592_vm2, %v539_v45 }
  0xe5   :  { %620 = vst.msk [vmem:[%s1365_s3 + $0x6c] sm:$0xf] %vm592_vm2, %v555_v46  ;;  %v475_v47 = vpop.f32.mrf.mxu2  ;;  %v515_v48 = vpop.f32.mrf.mxu3 }
  0xe6   :  { %v476_v49 = vadd.f32 %v1040_v34, %v475_v47  ;;  %v516_v50 = vadd.f32 %v1040_v34, %v515_v48  ;;  %v398_v51 = vpop.f32.mrf.mxu0  ;;  %v438_v52 = vpop.f32.mrf.mxu1 }
  0xe7   :  { %v399_v53 = vadd.f32 %v1040_v34, %v398_v51  ;;  %v439_v54 = vadd.f32 %v1040_v34, %v438_v52 }
  0xe8   :  { %v571_v55 = vpack.c.bf16 %v476_v49, %v476_v49  ;;  %v587_v56 = vpack.c.bf16 %v516_v50, %v516_v50 }
  0xe9   :  { %v540_v57 = vpack.c.bf16 %v399_v53, %v399_v53  ;;  %v556_v58 = vpack.c.bf16 %v439_v54, %v439_v54 }
  0xea   :  { %636 = vst.msk [vmem:[%s1365_s3 + $0xac] sm:$0xf] %vm592_vm2, %v571_v55 }
  0xeb   :  { %652 = vst.msk [vmem:[%s1365_s3 + $0xec] sm:$0xf] %vm592_vm2, %v587_v56 }
  0xec   :  { %605 = vst.msk [vmem:[%s1365_s3 + $0x30] sm:$0xf] %vm592_vm2, %v540_v57 }
  0xed   :  { %621 = vst.msk [vmem:[%s1365_s3 + $0x70] sm:$0xf] %vm592_vm2, %v556_v58  ;;  %v478_v59 = vpop.f32.mrf.mxu2  ;;  %v518_v60 = vpop.f32.mrf.mxu3 }
  0xee   :  { %v479_v61 = vadd.f32 %v1040_v34, %v478_v59  ;;  %v519_v62 = vadd.f32 %v1040_v34, %v518_v60  ;;  %v400_v63 = vpop.f32.mrf.mxu0  ;;  %v440_v0 = vpop.f32.mrf.mxu1 }
  0xef   :  { %v401_v1 = vadd.f32 %v1040_v34, %v400_v63  ;;  %v441_v2 = vadd.f32 %v1040_v34, %v440_v0 }
  0xf0   :  { %v572_v3 = vpack.c.bf16 %v479_v61, %v479_v61  ;;  %v588_v4 = vpack.c.bf16 %v519_v62, %v519_v62 }
  0xf1   :  { %v541_v5 = vpack.c.bf16 %v401_v1, %v401_v1  ;;  %v557_v6 = vpack.c.bf16 %v441_v2, %v441_v2 }
  0xf2   :  { %637 = vst.msk [vmem:[%s1365_s3 + $0xb0] sm:$0xf] %vm592_vm2, %v572_v3 }
  0xf3   :  { %653 = vst.msk [vmem:[%s1365_s3 + $0xf0] sm:$0xf] %vm592_vm2, %v588_v4 }
  0xf4   :  { %606 = vst.msk [vmem:[%s1365_s3 + $0x34] sm:$0xf] %vm592_vm2, %v541_v5 }
  0xf5   :  { %622 = vst.msk [vmem:[%s1365_s3 + $0x74] sm:$0xf] %vm592_vm2, %v557_v6  ;;  %v480_v7 = vpop.f32.mrf.mxu2  ;;  %v520_v8 = vpop.f32.mrf.mxu3 }
  0xf6   :  { %v481_v9 = vadd.f32 %v1040_v34, %v480_v7  ;;  %v521_v10 = vadd.f32 %v1040_v34, %v520_v8  ;;  %v403_v11 = vpop.f32.mrf.mxu0  ;;  %v443_v12 = vpop.f32.mrf.mxu1 }
  0xf7   :  { %v404_v13 = vadd.f32 %v1040_v34, %v403_v11  ;;  %v444_v14 = vadd.f32 %v1040_v34, %v443_v12 }
  0xf8   :  { %v573_v15 = vpack.c.bf16 %v481_v9, %v481_v9  ;;  %v589_v16 = vpack.c.bf16 %v521_v10, %v521_v10 }
  0xf9   :  { %v542_v17 = vpack.c.bf16 %v404_v13, %v404_v13  ;;  %v558_v18 = vpack.c.bf16 %v444_v14, %v444_v14 }
  0xfa   :  { %638 = vst.msk [vmem:[%s1365_s3 + $0xb4] sm:$0xf] %vm592_vm2, %v573_v15 }
  0xfb   :  { %654 = vst.msk [vmem:[%s1365_s3 + $0xf4] sm:$0xf] %vm592_vm2, %v589_v16 }
  0xfc   :  { %607 = vst.msk [vmem:[%s1365_s3 + $0x38] sm:$0xf] %vm592_vm2, %v542_v17 }
  0xfd   :  { %623 = vst.msk [vmem:[%s1365_s3 + $0x78] sm:$0xf] %vm592_vm2, %v558_v18  ;;  %v483_v19 = vpop.f32.mrf.mxu2  ;;  %v523_v20 = vpop.f32.mrf.mxu3 }
  0xfe   :  { %v484_v21 = vadd.f32 %v1040_v34, %v483_v19  ;;  %v524_v22 = vadd.f32 %v1040_v34, %v523_v20  ;;  %v405_v23 = vpop.f32.mrf.mxu0  ;;  %v445_v24 = vpop.f32.mrf.mxu1 }
  0xff   :  { %v406_v25 = vadd.f32 %v1040_v34, %v405_v23  ;;  %v446_v26 = vadd.f32 %v1040_v34, %v445_v24 }
 0x100   :  { %v574_v27 = vpack.c.bf16 %v484_v21, %v484_v21  ;;  %v590_v28 = vpack.c.bf16 %v524_v22, %v524_v22 }
 0x101   :  { %v543_v29 = vpack.c.bf16 %v406_v25, %v406_v25  ;;  %v559_v30 = vpack.c.bf16 %v446_v26, %v446_v26 }
 0x102   :  { %639 = vst.msk [vmem:[%s1365_s3 + $0xb8] sm:$0xf] %vm592_vm2, %v574_v27 }
 0x103   :  { %655 = vst.msk [vmem:[%s1365_s3 + $0xf8] sm:$0xf] %vm592_vm2, %v590_v28 }
 0x104   :  { %608 = vst.msk [vmem:[%s1365_s3 + $0x3c] sm:$0xf] %vm592_vm2, %v543_v29 }
 0x105   :  { %624 = vst.msk [vmem:[%s1365_s3 + $0x7c] sm:$0xf] %vm592_vm2, %v559_v30  ;;  %v485_v31 = vpop.f32.mrf.mxu2  ;;  %v525_v32 = vpop.f32.mrf.mxu3 }
 0x106   :  { %v486_v33 = vadd.f32 %v1040_v34, %v485_v31  ;;  %v526_v35 = vadd.f32 %v1040_v34, %v525_v32 }
 0x108   :  { %v575_v36 = vpack.c.bf16 %v486_v33, %v486_v33  ;;  %v591_v37 = vpack.c.bf16 %v526_v35, %v526_v35 }
 0x10a   :  { %640 = vst.msk [vmem:[%s1365_s3 + $0xbc] sm:$0xf] %vm592_vm2, %v575_v36 }
 0x10b   :  { %656 = vst.msk [vmem:[%s1365_s3 + $0xfc] sm:$0xf] %vm592_vm2, %v591_v37 }
 0x10c   :  { %661 = vsyncpa [#allocation3], 1 }

// kernel: _lambda_.4
= control target key start
LH: loop header
LB: loop body
LE: loop exit
PB: predicated region body
PF: predicated region fallthrough
CT: control target
= control target key end

     0   :  { %s2141_s18 = smov 0   ;;  %s2510_s0 = inlined_call_operand.vmem [shape: bf16[2048,36], index: 0, kind: input, shape index: {}]   ;;  %s2511_s1 = inlined_call_operand.vmem [shape: bf16[2048,36], index: 1, kind: input, shape index: {}]   ;;  %s2512_s2 = inlined_call_operand.vmem [shape: bf16[36,4], index: 2, kind: input, shape index: {}]   ;;  %s2513_s3 = inlined_call_operand.vmem [shape: bf16[36,4], index: 3, kind: input, shape index: {}]   ;;  %s2514_s4 = inlined_call_operand.vmem [shape: f32[1,4], index: 4, kind: input, shape index: {}]   ;;  %s2515_s5 = inlined_call_operand.vmem [shape: bf16[2048,4], index: 5, kind: output, shape index: {}]  }
   0x1 LB: > { %s1670_s19 = sadd.s32 4294967295, %s2109_s18   ;;  %p1674_p0 = scmp.ge.s32.totalorder %s2109_s18, 1  ;;  %s2109_s18 = sphi %s2141_s18, %s15_s18  }
   0x2   : > { %p199_p1 = scmp.lt.s32.totalorder %s2109_s18, 5 }
   0x4   : > { %p200_p2 = pnand %p1674_p0, %p199_p1 }
   0x5   : > { %s1675_s24 = sshll.u32 (!%p200_p2), %s1670_s19, 6 }
   0x6   : > { %203 = sbr.rel (%p200_p2) target bundleno = 420 (0x1a4), region = 40  ;;  %p233_p3 = scmp.lt.s32.totalorder (!%p200_p2), %s1675_s24, 255 }
   0xb   : > { %v388_v0 = vld [vmem:[%s2513_s3 + $0x10] sm:$0x3]  ;;  %vm661_vm0 = vcmask 1041408   ;;  %s2517_s24 = smov (!%p233_p3, %s1675_s24), 255  ;;  %v2086_v8 = vld [vmem:[%s2513_s3 + $0x8] sm:$0xff]  ;;  %v2085_v10 = vld [vmem:[%s2513_s3] sm:$0xff] }
   0xc   : > { %v319_v1 = vld [vmem:[%s2512_s2 + $0x10] sm:$0x3]  ;;  %v558_v2 = vunpack.c.l.b16 %v388_v0  ;;  %v2052_v9 = vld [vmem:[%s2512_s2 + $0x8] sm:$0xff]  ;;  %s2161_s29 = sshll.u32 %s2517_s24, 2  ;;  %v2051_v11 = vld [vmem:[%s2512_s2] sm:$0xff]  ;;  %vm564_vm1 = vcmask 293888  }
   0xd   : > { %v1003_v3 = vunpack.c.l.b16 %v319_v1  ;;  %s2170_s9 = scalar_lea.vmem %s2511_s1, %s2161_s29  ;;  %s2179_s14 = scalar_lea.vmem %s2510_s0, %s2161_s29  ;;  %v2250_v47 = vld [vmem:[%s2514_s4] ss:$0 sm:$0xff]  ;;  %vm1537_vm2 = vcmask 27648  }
   0xe   : > { %v561_v4 = vpack.c.b16 %v558_v2, %v558_v2  ;;  %v2053_v12 = vld [vmem:[%s2170_s9] sm:$0xff]  ;;  %v2054_v16 = vld [vmem:[%s2170_s9 + $0x8] sm:$0xff]  ;;  %v2055_v20 = vld [vmem:[%s2170_s9 + $0x10] sm:$0xff]  ;;  %s2263_s20 = scalar_lea.vmem %s2515_s5, %s2161_s29 }
   0xf   : > { %v1006_v5 = vpack.c.b16 %v1003_v3, %v1003_v3  ;;  %v2069_v13 = vld [vmem:[%s2170_s9 + $0x80] sm:$0xff]  ;;  %v2070_v17 = vld [vmem:[%s2170_s9 + $0x88] sm:$0xff]  ;;  %v2071_v21 = vld [vmem:[%s2170_s9 + $0x90] sm:$0xff] }
  0x10   : > { %v663_v6 = vsel %vm661_vm0, %v561_v4, 0  ;;  %v2019_v14 = vld [vmem:[%s2179_s14] sm:$0xff]  ;;  %v2020_v18 = vld [vmem:[%s2179_s14 + $0x8] sm:$0xff]  ;;  %v2021_v22 = vld [vmem:[%s2179_s14 + $0x10] sm:$0xff] }
  0x11   : > { %v1106_v7 = vsel %vm661_vm0, %v1006_v5, 0  ;;  %670 = vmatpush.bf16.msra.mxu0 %v663_v6  ;;  %2087 = vmatpush.bf16.msra.mxu2 %v663_v6  ;;  %v2035_v15 = vld [vmem:[%s2179_s14 + $0x80] sm:$0xff]  ;;  %v2036_v19 = vld [vmem:[%s2179_s14 + $0x88] sm:$0xff]  ;;  %v2037_v23 = vld [vmem:[%s2179_s14 + $0x90] sm:$0xff] }
  0x12   : > { %1113 = vmatpush.bf16.msra.mxu1 %v1106_v7  ;;  %2090 = vmatpush.bf16.msra.mxu3 %v1106_v7  ;;  %v2056_v24 = vld [vmem:[%s2170_s9 + $0x18] sm:$0xff]  ;;  %v2057_v28 = vld [vmem:[%s2170_s9 + $0x20] sm:$0xff]  ;;  %v2058_v32 = vld [vmem:[%s2170_s9 + $0x28] sm:$0xff] }
  0x13   : > { %v2072_v25 = vld [vmem:[%s2170_s9 + $0x98] sm:$0xff]  ;;  %v2073_v29 = vld [vmem:[%s2170_s9 + $0xa0] sm:$0xff]  ;;  %v2074_v33 = vld [vmem:[%s2170_s9 + $0xa8] sm:$0xff] }
  0x14   : > { %v2022_v26 = vld [vmem:[%s2179_s14 + $0x18] sm:$0xff]  ;;  %v2023_v30 = vld [vmem:[%s2179_s14 + $0x20] sm:$0xff]  ;;  %v2024_v34 = vld [vmem:[%s2179_s14 + $0x28] sm:$0xff] }
  0x15   : > { %671 = vmatpush.bf16.msra.mxu0 %v2086_v8  ;;  %2088 = vmatpush.bf16.msra.mxu2 %v2086_v8  ;;  %v2038_v27 = vld [vmem:[%s2179_s14 + $0x98] sm:$0xff]  ;;  %v2039_v31 = vld [vmem:[%s2179_s14 + $0xa0] sm:$0xff]  ;;  %v2040_v35 = vld [vmem:[%s2179_s14 + $0xa8] sm:$0xff] }
  0x16   : > { %1114 = vmatpush.bf16.msra.mxu1 %v2052_v9  ;;  %2091 = vmatpush.bf16.msra.mxu3 %v2052_v9  ;;  %v2059_v36 = vld [vmem:[%s2170_s9 + $0x30] sm:$0xff]  ;;  %v2060_v40 = vld [vmem:[%s2170_s9 + $0x38] sm:$0xff]  ;;  %v2061_v44 = vld [vmem:[%s2170_s9 + $0x40] sm:$0xff] }
  0x17   : > { %v2075_v37 = vld [vmem:[%s2170_s9 + $0xb0] sm:$0xff]  ;;  %v2076_v41 = vld [vmem:[%s2170_s9 + $0xb8] sm:$0xff]  ;;  %v2077_v45 = vld [vmem:[%s2170_s9 + $0xc0] sm:$0xff] }
  0x18   : > { %v2025_v38 = vld [vmem:[%s2179_s14 + $0x30] sm:$0xff]  ;;  %v2026_v42 = vld [vmem:[%s2179_s14 + $0x38] sm:$0xff]  ;;  %v2027_v48 = vld [vmem:[%s2179_s14 + $0x40] sm:$0xff] }
  0x19   : > { %672 = vmatpush.bf16.msra.mxu0 %v2085_v10  ;;  %2089 = vmatpush.bf16.msra.mxu2 %v2085_v10  ;;  %v2041_v39 = vld [vmem:[%s2179_s14 + $0xb0] sm:$0xff]  ;;  %v2042_v43 = vld [vmem:[%s2179_s14 + $0xb8] sm:$0xff]  ;;  %v2043_v49 = vld [vmem:[%s2179_s14 + $0xc0] sm:$0xff] }
  0x1a   : > { %1115 = vmatpush.bf16.msra.mxu1 %v2051_v11  ;;  %2092 = vmatpush.bf16.msra.mxu3 %v2051_v11  ;;  %v2062_v5 = vld [vmem:[%s2170_s9 + $0x48] sm:$0xff] }
  0x1b   : > { %v2078_v6 = vld [vmem:[%s2170_s9 + $0xc8] sm:$0xff] }
  0x1c   : > { %1817 = vmatmul.msk.bf16.vlgmr.msra.gmra.mxu0 %vm564_vm1, %v2053_v12  ;;  %1833 = vmatmul.msk.bf16.vlgmr.msra.gmra.mxu2 %vm564_vm1, %v2069_v13  ;;  %v2028_v11 = vld [vmem:[%s2179_s14 + $0x48] sm:$0xff] }
  0x1d   : > { %1985 = vmatmul.msk.bf16.vlgmr.msra.gmra.mxu1 %vm564_vm1, %v2019_v14  ;;  %2001 = vmatmul.msk.bf16.vlgmr.msra.gmra.mxu3 %vm564_vm1, %v2035_v15  ;;  %v2044_v12 = vld [vmem:[%s2179_s14 + $0xc8] sm:$0xff] }
  0x2c   : > { %1818 = vmatmul.msk.bf16.gmra.mxu0 %vm564_vm1, %v2054_v16  ;;  %1834 = vmatmul.msk.bf16.gmra.mxu2 %vm564_vm1, %v2070_v17 }
  0x2d   : > { %1986 = vmatmul.msk.bf16.gmra.mxu1 %vm564_vm1, %v2020_v18  ;;  %2002 = vmatmul.msk.bf16.gmra.mxu3 %vm564_vm1, %v2036_v19 }
  0x3c   : > { %1819 = vmatmul.msk.bf16.gmra.mxu0 %vm564_vm1, %v2055_v20  ;;  %1835 = vmatmul.msk.bf16.gmra.mxu2 %vm564_vm1, %v2071_v21 }
  0x3d   : > { %1987 = vmatmul.msk.bf16.gmra.mxu1 %vm564_vm1, %v2021_v22  ;;  %2003 = vmatmul.msk.bf16.gmra.mxu3 %vm564_vm1, %v2037_v23 }
  0x4c   : > { %1820 = vmatmul.msk.bf16.gmra.mxu0 %vm564_vm1, %v2056_v24  ;;  %1836 = vmatmul.msk.bf16.gmra.mxu2 %vm564_vm1, %v2072_v25 }
  0x4d   : > { %1988 = vmatmul.msk.bf16.gmra.mxu1 %vm564_vm1, %v2022_v26  ;;  %2004 = vmatmul.msk.bf16.gmra.mxu3 %vm564_vm1, %v2038_v27 }
  0x5c   : > { %1821 = vmatmul.msk.bf16.gmra.mxu0 %vm564_vm1, %v2057_v28  ;;  %1837 = vmatmul.msk.bf16.gmra.mxu2 %vm564_vm1, %v2073_v29 }
  0x5d   : > { %1989 = vmatmul.msk.bf16.gmra.mxu1 %vm564_vm1, %v2023_v30  ;;  %2005 = vmatmul.msk.bf16.gmra.mxu3 %vm564_vm1, %v2039_v31 }
  0x6c   : > { %1822 = vmatmul.msk.bf16.gmra.mxu0 %vm564_vm1, %v2058_v32  ;;  %1838 = vmatmul.msk.bf16.gmra.mxu2 %vm564_vm1, %v2074_v33 }
  0x6d   : > { %1990 = vmatmul.msk.bf16.gmra.mxu1 %vm564_vm1, %v2024_v34  ;;  %2006 = vmatmul.msk.bf16.gmra.mxu3 %vm564_vm1, %v2040_v35 }
  0x7c   : > { %1823 = vmatmul.msk.bf16.gmra.mxu0 %vm564_vm1, %v2059_v36  ;;  %1839 = vmatmul.msk.bf16.gmra.mxu2 %vm564_vm1, %v2075_v37  ;;  %v2063_v37 = vld [vmem:[%s2170_s9 + $0x50] sm:$0xff] }
  0x7d   : > { %1991 = vmatmul.msk.bf16.gmra.mxu1 %vm564_vm1, %v2025_v38  ;;  %2007 = vmatmul.msk.bf16.gmra.mxu3 %vm564_vm1, %v2041_v39  ;;  %v2079_v38 = vld [vmem:[%s2170_s9 + $0xd0] sm:$0xff] }
  0x8c   : > { %1824 = vmatmul.msk.bf16.gmra.mxu0 %vm564_vm1, %v2060_v40  ;;  %1840 = vmatmul.msk.bf16.gmra.mxu2 %vm564_vm1, %v2076_v41 }
  0x8d   : > { %1992 = vmatmul.msk.bf16.gmra.mxu1 %vm564_vm1, %v2026_v42  ;;  %2008 = vmatmul.msk.bf16.gmra.mxu3 %vm564_vm1, %v2042_v43  ;;  %v2029_v43 = vld [vmem:[%s2179_s14 + $0x50] sm:$0xff] }
  0x99   : > { %v674_v46 = vpop.f32.mrf.mxu0 }
  0x9a   : > { %v1117_v50 = vpop.f32.mrf.mxu1 }
  0x9b   : > { %v1118_v51 = vadd.f32 %v1117_v50, %v674_v46 }
  0x9c   : > { %1825 = vmatmul.msk.bf16.gmra.mxu0 %vm564_vm1, %v2061_v44  ;;  %1841 = vmatmul.msk.bf16.gmra.mxu2 %vm564_vm1, %v2077_v45  ;;  %v2045_v44 = vld [vmem:[%s2179_s14 + $0xd0] sm:$0xff] }
  0x9d   : > { %v1281_v52 = vadd.f32 %v2250_v47, %v1118_v51  ;;  %1993 = vmatmul.msk.bf16.gmra.mxu1 %vm564_vm1, %v2027_v48  ;;  %2009 = vmatmul.msk.bf16.gmra.mxu3 %vm564_vm1, %v2043_v49 }
  0x9f   : > { %v1345_v53 = vmul.f32 0.2, %v1281_v52  ;;  %v754_v54 = vpop.f32.mrf.mxu2 }
  0xa0   : > { %v1197_v55 = vpop.f32.mrf.mxu3 }
  0xa1   : > { %v1409_v56 = vmax.f32 %v1281_v52, %v1345_v53  ;;  %v1198_v57 = vadd.f32 %v1197_v55, %v754_v54  ;;  %v676_v58 = vpop.f32.mrf.mxu0 }
  0xa2   : > { %v1119_v59 = vpop.f32.mrf.mxu1 }
  0xa3   : > { %v1473_v60 = vpack.c.bf16 %v1409_v56, %v1409_v56  ;;  %v1313_v61 = vadd.f32 %v2250_v47, %v1198_v57  ;;  %v1120_v62 = vadd.f32 %v1119_v59, %v676_v58 }
  0xa5   : > { %1538 = vst.msk [vmem:[%s2263_s20] sm:$0xf] %vm1537_vm2, %v1473_v60  ;;  %v1377_v63 = vmul.f32 0.2, %v1313_v61  ;;  %v1282_v0 = vadd.f32 %v2250_v47, %v1120_v62 }
  0xa7   : > { %v1441_v1 = vmax.f32 %v1313_v61, %v1377_v63  ;;  %v1346_v2 = vmul.f32 0.2, %v1282_v0  ;;  %v756_v3 = vpop.f32.mrf.mxu2 }
  0xa8   : > { %v1199_v4 = vpop.f32.mrf.mxu3 }
  0xa9   : > { %v1505_v7 = vpack.c.bf16 %v1441_v1, %v1441_v1  ;;  %v1410_v8 = vmax.f32 %v1282_v0, %v1346_v2  ;;  %v1200_v9 = vadd.f32 %v1199_v4, %v756_v3  ;;  %v679_v10 = vpop.f32.mrf.mxu0 }
  0xaa   : > { %v1122_v13 = vpop.f32.mrf.mxu1 }
  0xab   : > { %1570 = vst.msk [vmem:[%s2263_s20 + $0x80] sm:$0xf] %vm1537_vm2, %v1505_v7  ;;  %v1474_v14 = vpack.c.bf16 %v1410_v8, %v1410_v8  ;;  %v1314_v15 = vadd.f32 %v2250_v47, %v1200_v9  ;;  %v1123_v16 = vadd.f32 %v1122_v13, %v679_v10  ;;  %v2080_v7 = vld [vmem:[%s2170_s9 + $0xd8] sm:$0xff] }
  0xac   : > { %1826 = vmatmul.msk.bf16.gmra.mxu0 %vm564_vm1, %v2062_v5  ;;  %1842 = vmatmul.msk.bf16.gmra.mxu2 %vm564_vm1, %v2078_v6  ;;  %v2064_v6 = vld [vmem:[%s2170_s9 + $0x58] sm:$0xff] }
  0xad   : > { %1539 = vst.msk [vmem:[%s2263_s20 + $0x4] sm:$0xf] %vm1537_vm2, %v1474_v14  ;;  %v1378_v17 = vmul.f32 0.2, %v1314_v15  ;;  %v1283_v18 = vadd.f32 %v2250_v47, %v1123_v16  ;;  %1994 = vmatmul.msk.bf16.gmra.mxu1 %vm564_vm1, %v2028_v11  ;;  %2010 = vmatmul.msk.bf16.gmra.mxu3 %vm564_vm1, %v2044_v12  ;;  %v2030_v12 = vld [vmem:[%s2179_s14 + $0x58] sm:$0xff] }
  0xae   : > { %v2046_v13 = vld [vmem:[%s2179_s14 + $0xd8] sm:$0xff] }
  0xaf   : > { %v1442_v19 = vmax.f32 %v1314_v15, %v1378_v17  ;;  %v1347_v20 = vmul.f32 0.2, %v1283_v18  ;;  %v759_v21 = vpop.f32.mrf.mxu2 }
  0xb0   : > { %v1202_v22 = vpop.f32.mrf.mxu3 }
  0xb1   : > { %v1506_v23 = vpack.c.bf16 %v1442_v19, %v1442_v19  ;;  %v1411_v24 = vmax.f32 %v1283_v18, %v1347_v20  ;;  %v1203_v25 = vadd.f32 %v1202_v22, %v759_v21  ;;  %v681_v26 = vpop.f32.mrf.mxu0 }
  0xb2   : > { %v1124_v27 = vpop.f32.mrf.mxu1 }
  0xb3   : > { %1571 = vst.msk [vmem:[%s2263_s20 + $0x84] sm:$0xf] %vm1537_vm2, %v1506_v23  ;;  %v1475_v28 = vpack.c.bf16 %v1411_v24, %v1411_v24  ;;  %v1315_v29 = vadd.f32 %v2250_v47, %v1203_v25  ;;  %v1125_v30 = vadd.f32 %v1124_v27, %v681_v26 }
  0xb5   : > { %1540 = vst.msk [vmem:[%s2263_s20 + $0x8] sm:$0xf] %vm1537_vm2, %v1475_v28  ;;  %v1379_v31 = vmul.f32 0.2, %v1315_v29  ;;  %v1284_v32 = vadd.f32 %v2250_v47, %v1125_v30 }
  0xb7   : > { %v1443_v33 = vmax.f32 %v1315_v29, %v1379_v31  ;;  %v1348_v34 = vmul.f32 0.2, %v1284_v32  ;;  %v761_v35 = vpop.f32.mrf.mxu2 }
  0xb8   : > { %v1204_v36 = vpop.f32.mrf.mxu3 }
  0xb9   : > { %v1507_v39 = vpack.c.bf16 %v1443_v33, %v1443_v33  ;;  %v1412_v40 = vmax.f32 %v1284_v32, %v1348_v34  ;;  %v1205_v41 = vadd.f32 %v1204_v36, %v761_v35  ;;  %v684_v42 = vpop.f32.mrf.mxu0 }
  0xba   : > { %v1127_v45 = vpop.f32.mrf.mxu1 }
  0xbb   : > { %1572 = vst.msk [vmem:[%s2263_s20 + $0x88] sm:$0xf] %vm1537_vm2, %v1507_v39  ;;  %v1476_v46 = vpack.c.bf16 %v1412_v40, %v1412_v40  ;;  %v1316_v48 = vadd.f32 %v2250_v47, %v1205_v41  ;;  %v1128_v49 = vadd.f32 %v1127_v45, %v684_v42  ;;  %v2081_v39 = vld [vmem:[%s2170_s9 + $0xe0] sm:$0xff] }
  0xbc   : > { %1827 = vmatmul.msk.bf16.gmra.mxu0 %vm564_vm1, %v2063_v37  ;;  %1843 = vmatmul.msk.bf16.gmra.mxu2 %vm564_vm1, %v2079_v38  ;;  %v2065_v38 = vld [vmem:[%s2170_s9 + $0x60] sm:$0xff] }
  0xbd   : > { %1541 = vst.msk [vmem:[%s2263_s20 + $0xc] sm:$0xf] %vm1537_vm2, %v1476_v46  ;;  %v1380_v50 = vmul.f32 0.2, %v1316_v48  ;;  %v1285_v51 = vadd.f32 %v2250_v47, %v1128_v49  ;;  %1995 = vmatmul.msk.bf16.gmra.mxu1 %vm564_vm1, %v2029_v43  ;;  %2011 = vmatmul.msk.bf16.gmra.mxu3 %vm564_vm1, %v2045_v44  ;;  %v2031_v44 = vld [vmem:[%s2179_s14 + $0x60] sm:$0xff] }
  0xbe   : > { %v2047_v45 = vld [vmem:[%s2179_s14 + $0xe0] sm:$0xff] }
  0xbf   : > { %v1444_v52 = vmax.f32 %v1316_v48, %v1380_v50  ;;  %v1349_v53 = vmul.f32 0.2, %v1285_v51  ;;  %v764_v54 = vpop.f32.mrf.mxu2 }
  0xc0   : > { %v1207_v55 = vpop.f32.mrf.mxu3 }
  0xc1   : > { %v1508_v56 = vpack.c.bf16 %v1444_v52, %v1444_v52  ;;  %v1413_v57 = vmax.f32 %v1285_v51, %v1349_v53  ;;  %v1208_v58 = vadd.f32 %v1207_v55, %v764_v54  ;;  %v686_v59 = vpop.f32.mrf.mxu0 }
  0xc2   : > { %v1129_v60 = vpop.f32.mrf.mxu1 }
  0xc3   : > { %1573 = vst.msk [vmem:[%s2263_s20 + $0x8c] sm:$0xf] %vm1537_vm2, %v1508_v56  ;;  %v1477_v61 = vpack.c.bf16 %v1413_v57, %v1413_v57  ;;  %v1317_v62 = vadd.f32 %v2250_v47, %v1208_v58  ;;  %v1130_v63 = vadd.f32 %v1129_v60, %v686_v59 }
  0xc5   : > { %1542 = vst.msk [vmem:[%s2263_s20 + $0x10] sm:$0xf] %vm1537_vm2, %v1477_v61  ;;  %v1381_v0 = vmul.f32 0.2, %v1317_v62  ;;  %v1286_v1 = vadd.f32 %v2250_v47, %v1130_v63 }
  0xc7   : > { %v1445_v2 = vmax.f32 %v1317_v62, %v1381_v0  ;;  %v1350_v3 = vmul.f32 0.2, %v1286_v1  ;;  %v766_v4 = vpop.f32.mrf.mxu2 }
  0xc8   : > { %v1209_v5 = vpop.f32.mrf.mxu3 }
  0xc9   : > { %v1509_v8 = vpack.c.bf16 %v1445_v2, %v1445_v2  ;;  %v1414_v9 = vmax.f32 %v1286_v1, %v1350_v3  ;;  %v1210_v10 = vadd.f32 %v1209_v5, %v766_v4  ;;  %v689_v11 = vpop.f32.mrf.mxu0 }
  0xca   : > { %v1132_v14 = vpop.f32.mrf.mxu1 }
  0xcb   : > { %1574 = vst.msk [vmem:[%s2263_s20 + $0x90] sm:$0xf] %vm1537_vm2, %v1509_v8  ;;  %v1478_v15 = vpack.c.bf16 %v1414_v9, %v1414_v9  ;;  %v1318_v16 = vadd.f32 %v2250_v47, %v1210_v10  ;;  %v1133_v17 = vadd.f32 %v1132_v14, %v689_v11  ;;  %v2082_v8 = vld [vmem:[%s2170_s9 + $0xe8] sm:$0xff] }
  0xcc   : > { %1828 = vmatmul.msk.bf16.gmra.mxu0 %vm564_vm1, %v2064_v6  ;;  %1844 = vmatmul.msk.bf16.gmra.mxu2 %vm564_vm1, %v2080_v7  ;;  %v2066_v7 = vld [vmem:[%s2170_s9 + $0x68] sm:$0xff] }
  0xcd   : > { %1543 = vst.msk [vmem:[%s2263_s20 + $0x14] sm:$0xf] %vm1537_vm2, %v1478_v15  ;;  %v1382_v18 = vmul.f32 0.2, %v1318_v16  ;;  %v1287_v19 = vadd.f32 %v2250_v47, %v1133_v17  ;;  %1996 = vmatmul.msk.bf16.gmra.mxu1 %vm564_vm1, %v2030_v12  ;;  %2012 = vmatmul.msk.bf16.gmra.mxu3 %vm564_vm1, %v2046_v13  ;;  %v2032_v13 = vld [vmem:[%s2179_s14 + $0x68] sm:$0xff] }
  0xce   : > { %v2048_v14 = vld [vmem:[%s2179_s14 + $0xe8] sm:$0xff] }
  0xcf   : > { %v1446_v20 = vmax.f32 %v1318_v16, %v1382_v18  ;;  %v1351_v21 = vmul.f32 0.2, %v1287_v19  ;;  %v769_v22 = vpop.f32.mrf.mxu2 }
  0xd0   : > { %v1212_v23 = vpop.f32.mrf.mxu3 }
  0xd1   : > { %v1510_v24 = vpack.c.bf16 %v1446_v20, %v1446_v20  ;;  %v1415_v25 = vmax.f32 %v1287_v19, %v1351_v21  ;;  %v1213_v26 = vadd.f32 %v1212_v23, %v769_v22  ;;  %v691_v27 = vpop.f32.mrf.mxu0 }
  0xd2   : > { %v1134_v28 = vpop.f32.mrf.mxu1 }
  0xd3   : > { %1575 = vst.msk [vmem:[%s2263_s20 + $0x94] sm:$0xf] %vm1537_vm2, %v1510_v24  ;;  %v1479_v29 = vpack.c.bf16 %v1415_v25, %v1415_v25  ;;  %v1319_v30 = vadd.f32 %v2250_v47, %v1213_v26  ;;  %v1135_v31 = vadd.f32 %v1134_v28, %v691_v27 }
  0xd5   : > { %1544 = vst.msk [vmem:[%s2263_s20 + $0x18] sm:$0xf] %vm1537_vm2, %v1479_v29  ;;  %v1383_v32 = vmul.f32 0.2, %v1319_v30  ;;  %v1288_v33 = vadd.f32 %v2250_v47, %v1135_v31 }
  0xd7   : > { %v1447_v34 = vmax.f32 %v1319_v30, %v1383_v32  ;;  %v1352_v35 = vmul.f32 0.2, %v1288_v33  ;;  %v771_v36 = vpop.f32.mrf.mxu2 }
  0xd8   : > { %v1214_v37 = vpop.f32.mrf.mxu3 }
  0xd9   : > { %v1511_v40 = vpack.c.bf16 %v1447_v34, %v1447_v34  ;;  %v1416_v41 = vmax.f32 %v1288_v33, %v1352_v35  ;;  %v1215_v42 = vadd.f32 %v1214_v37, %v771_v36  ;;  %v694_v43 = vpop.f32.mrf.mxu0 }
  0xda   : > { %v1137_v46 = vpop.f32.mrf.mxu1 }
  0xdb   : > { %1576 = vst.msk [vmem:[%s2263_s20 + $0x98] sm:$0xf] %vm1537_vm2, %v1511_v40  ;;  %v1480_v48 = vpack.c.bf16 %v1416_v41, %v1416_v41  ;;  %v1320_v49 = vadd.f32 %v2250_v47, %v1215_v42  ;;  %v1138_v50 = vadd.f32 %v1137_v46, %v694_v43  ;;  %v2083_v40 = vld [vmem:[%s2170_s9 + $0xf0] sm:$0xff] }
  0xdc   : > { %1829 = vmatmul.msk.bf16.gmra.mxu0 %vm564_vm1, %v2065_v38  ;;  %1845 = vmatmul.msk.bf16.gmra.mxu2 %vm564_vm1, %v2081_v39  ;;  %v2067_v39 = vld [vmem:[%s2170_s9 + $0x70] sm:$0xff] }
  0xdd   : > { %1545 = vst.msk [vmem:[%s2263_s20 + $0x1c] sm:$0xf] %vm1537_vm2, %v1480_v48  ;;  %v1384_v51 = vmul.f32 0.2, %v1320_v49  ;;  %v1289_v52 = vadd.f32 %v2250_v47, %v1138_v50  ;;  %1997 = vmatmul.msk.bf16.gmra.mxu1 %vm564_vm1, %v2031_v44  ;;  %2013 = vmatmul.msk.bf16.gmra.mxu3 %vm564_vm1, %v2047_v45  ;;  %v2033_v45 = vld [vmem:[%s2179_s14 + $0x70] sm:$0xff] }
  0xde   : > { %v2049_v46 = vld [vmem:[%s2179_s14 + $0xf0] sm:$0xff] }
  0xdf   : > { %v1448_v53 = vmax.f32 %v1320_v49, %v1384_v51  ;;  %v1353_v54 = vmul.f32 0.2, %v1289_v52  ;;  %v774_v55 = vpop.f32.mrf.mxu2 }
  0xe0   : > { %v1217_v56 = vpop.f32.mrf.mxu3 }
  0xe1   : > { %v1512_v57 = vpack.c.bf16 %v1448_v53, %v1448_v53  ;;  %v1417_v58 = vmax.f32 %v1289_v52, %v1353_v54  ;;  %v1218_v59 = vadd.f32 %v1217_v56, %v774_v55  ;;  %v696_v60 = vpop.f32.mrf.mxu0 }
  0xe2   : > { %v1139_v61 = vpop.f32.mrf.mxu1 }
  0xe3   : > { %1577 = vst.msk [vmem:[%s2263_s20 + $0x9c] sm:$0xf] %vm1537_vm2, %v1512_v57  ;;  %v1481_v62 = vpack.c.bf16 %v1417_v58, %v1417_v58  ;;  %v1321_v63 = vadd.f32 %v2250_v47, %v1218_v59  ;;  %v1140_v0 = vadd.f32 %v1139_v61, %v696_v60 }
  0xe5   : > { %1546 = vst.msk [vmem:[%s2263_s20 + $0x20] sm:$0xf] %vm1537_vm2, %v1481_v62  ;;  %v1385_v1 = vmul.f32 0.2, %v1321_v63  ;;  %v1290_v2 = vadd.f32 %v2250_v47, %v1140_v0 }
  0xe7   : > { %v1449_v3 = vmax.f32 %v1321_v63, %v1385_v1  ;;  %v1354_v4 = vmul.f32 0.2, %v1290_v2  ;;  %v776_v5 = vpop.f32.mrf.mxu2 }
  0xe8   : > { %v1219_v6 = vpop.f32.mrf.mxu3 }
  0xe9   : > { %v1513_v9 = vpack.c.bf16 %v1449_v3, %v1449_v3  ;;  %v1418_v10 = vmax.f32 %v1290_v2, %v1354_v4  ;;  %v1220_v11 = vadd.f32 %v1219_v6, %v776_v5  ;;  %v699_v12 = vpop.f32.mrf.mxu0 }
  0xea   : > { %v1142_v15 = vpop.f32.mrf.mxu1 }
  0xeb   : > { %1578 = vst.msk [vmem:[%s2263_s20 + $0xa0] sm:$0xf] %vm1537_vm2, %v1513_v9  ;;  %v1482_v16 = vpack.c.bf16 %v1418_v10, %v1418_v10  ;;  %v1322_v17 = vadd.f32 %v2250_v47, %v1220_v11  ;;  %v1143_v18 = vadd.f32 %v1142_v15, %v699_v12  ;;  %v2084_v9 = vld [vmem:[%s2170_s9 + $0xf8] sm:$0xff] }
  0xec   : > { %1830 = vmatmul.msk.bf16.gmra.mxu0 %vm564_vm1, %v2066_v7  ;;  %1846 = vmatmul.msk.bf16.gmra.mxu2 %vm564_vm1, %v2082_v8  ;;  %v2068_v8 = vld [vmem:[%s2170_s9 + $0x78] sm:$0xff] }
  0xed   : > { %1547 = vst.msk [vmem:[%s2263_s20 + $0x24] sm:$0xf] %vm1537_vm2, %v1482_v16  ;;  %v1386_v19 = vmul.f32 0.2, %v1322_v17  ;;  %v1291_v20 = vadd.f32 %v2250_v47, %v1143_v18  ;;  %1998 = vmatmul.msk.bf16.gmra.mxu1 %vm564_vm1, %v2032_v13  ;;  %2014 = vmatmul.msk.bf16.gmra.mxu3 %vm564_vm1, %v2048_v14  ;;  %v2034_v14 = vld [vmem:[%s2179_s14 + $0x78] sm:$0xff] }
  0xee   : > { %v2050_v15 = vld [vmem:[%s2179_s14 + $0xf8] sm:$0xff] }
  0xef   : > { %v1450_v21 = vmax.f32 %v1322_v17, %v1386_v19  ;;  %v1355_v22 = vmul.f32 0.2, %v1291_v20  ;;  %v779_v23 = vpop.f32.mrf.mxu2 }
  0xf0   : > { %v1222_v24 = vpop.f32.mrf.mxu3 }
  0xf1   : > { %v1514_v25 = vpack.c.bf16 %v1450_v21, %v1450_v21  ;;  %v1419_v26 = vmax.f32 %v1291_v20, %v1355_v22  ;;  %v1223_v27 = vadd.f32 %v1222_v24, %v779_v23  ;;  %v701_v28 = vpop.f32.mrf.mxu0 }
  0xf2   : > { %v1144_v29 = vpop.f32.mrf.mxu1 }
  0xf3   : > { %1579 = vst.msk [vmem:[%s2263_s20 + $0xa4] sm:$0xf] %vm1537_vm2, %v1514_v25  ;;  %v1483_v30 = vpack.c.bf16 %v1419_v26, %v1419_v26  ;;  %v1323_v31 = vadd.f32 %v2250_v47, %v1223_v27  ;;  %v1145_v32 = vadd.f32 %v1144_v29, %v701_v28 }
  0xf5   : > { %1548 = vst.msk [vmem:[%s2263_s20 + $0x28] sm:$0xf] %vm1537_vm2, %v1483_v30  ;;  %v1387_v33 = vmul.f32 0.2, %v1323_v31  ;;  %v1292_v34 = vadd.f32 %v2250_v47, %v1145_v32 }
  0xf7   : > { %v1451_v35 = vmax.f32 %v1323_v31, %v1387_v33  ;;  %v1356_v36 = vmul.f32 0.2, %v1292_v34  ;;  %v781_v37 = vpop.f32.mrf.mxu2 }
  0xf8   : > { %v1224_v38 = vpop.f32.mrf.mxu3 }
  0xf9   : > { %v1515_v41 = vpack.c.bf16 %v1451_v35, %v1451_v35  ;;  %v1420_v42 = vmax.f32 %v1292_v34, %v1356_v36  ;;  %v1225_v43 = vadd.f32 %v1224_v38, %v781_v37  ;;  %v704_v44 = vpop.f32.mrf.mxu0 }
  0xfa   : > { %v1147_v48 = vpop.f32.mrf.mxu1 }
  0xfb   : > { %1580 = vst.msk [vmem:[%s2263_s20 + $0xa8] sm:$0xf] %vm1537_vm2, %v1515_v41  ;;  %v1484_v49 = vpack.c.bf16 %v1420_v42, %v1420_v42  ;;  %v1324_v50 = vadd.f32 %v2250_v47, %v1225_v43  ;;  %v1148_v51 = vadd.f32 %v1147_v48, %v704_v44 }
  0xfc   : > { %1831 = vmatmul.msk.bf16.gmra.mxu0 %vm564_vm1, %v2067_v39  ;;  %1847 = vmatmul.msk.bf16.gmra.mxu2 %vm564_vm1, %v2083_v40 }
  0xfd   : > { %1549 = vst.msk [vmem:[%s2263_s20 + $0x2c] sm:$0xf] %vm1537_vm2, %v1484_v49  ;;  %v1388_v52 = vmul.f32 0.2, %v1324_v50  ;;  %v1293_v53 = vadd.f32 %v2250_v47, %v1148_v51  ;;  %1999 = vmatmul.msk.bf16.gmra.mxu1 %vm564_vm1, %v2033_v45  ;;  %2015 = vmatmul.msk.bf16.gmra.mxu3 %vm564_vm1, %v2049_v46 }
  0xff   : > { %v1452_v54 = vmax.f32 %v1324_v50, %v1388_v52  ;;  %v1357_v55 = vmul.f32 0.2, %v1293_v53  ;;  %v784_v56 = vpop.f32.mrf.mxu2 }
 0x100   : > { %v1227_v57 = vpop.f32.mrf.mxu3 }
 0x101   : > { %v1516_v58 = vpack.c.bf16 %v1452_v54, %v1452_v54  ;;  %v1421_v59 = vmax.f32 %v1293_v53, %v1357_v55  ;;  %v1228_v60 = vadd.f32 %v1227_v57, %v784_v56  ;;  %v706_v61 = vpop.f32.mrf.mxu0 }
 0x102   : > { %v1149_v62 = vpop.f32.mrf.mxu1 }
 0x103   : > { %1581 = vst.msk [vmem:[%s2263_s20 + $0xac] sm:$0xf] %vm1537_vm2, %v1516_v58  ;;  %v1485_v63 = vpack.c.bf16 %v1421_v59, %v1421_v59  ;;  %v1325_v0 = vadd.f32 %v2250_v47, %v1228_v60  ;;  %v1150_v1 = vadd.f32 %v1149_v62, %v706_v61 }
 0x105   : > { %1550 = vst.msk [vmem:[%s2263_s20 + $0x30] sm:$0xf] %vm1537_vm2, %v1485_v63  ;;  %v1389_v2 = vmul.f32 0.2, %v1325_v0  ;;  %v1294_v3 = vadd.f32 %v2250_v47, %v1150_v1 }
 0x107   : > { %v1453_v4 = vmax.f32 %v1325_v0, %v1389_v2  ;;  %v1358_v5 = vmul.f32 0.2, %v1294_v3  ;;  %v786_v6 = vpop.f32.mrf.mxu2 }
 0x108   : > { %v1229_v7 = vpop.f32.mrf.mxu3 }
 0x109   : > { %v1517_v10 = vpack.c.bf16 %v1453_v4, %v1453_v4  ;;  %v1422_v11 = vmax.f32 %v1294_v3, %v1358_v5  ;;  %v1230_v12 = vadd.f32 %v1229_v7, %v786_v6  ;;  %v709_v13 = vpop.f32.mrf.mxu0 }
 0x10a   : > { %v1152_v16 = vpop.f32.mrf.mxu1 }
 0x10b   : > { %1582 = vst.msk [vmem:[%s2263_s20 + $0xb0] sm:$0xf] %vm1537_vm2, %v1517_v10  ;;  %v1486_v17 = vpack.c.bf16 %v1422_v11, %v1422_v11  ;;  %v1326_v18 = vadd.f32 %v2250_v47, %v1230_v12  ;;  %v1153_v19 = vadd.f32 %v1152_v16, %v709_v13 }
 0x10c   : > { %1832 = vmatmul.msk.bf16.gmra.mxu0 %vm564_vm1, %v2068_v8  ;;  %1848 = vmatmul.msk.bf16.gmra.mxu2 %vm564_vm1, %v2084_v9 }
 0x10d   : > { %1551 = vst.msk [vmem:[%s2263_s20 + $0x34] sm:$0xf] %vm1537_vm2, %v1486_v17  ;;  %v1390_v20 = vmul.f32 0.2, %v1326_v18  ;;  %v1295_v21 = vadd.f32 %v2250_v47, %v1153_v19  ;;  %2000 = vmatmul.msk.bf16.gmra.mxu1 %vm564_vm1, %v2034_v14  ;;  %2016 = vmatmul.msk.bf16.gmra.mxu3 %vm564_vm1, %v2050_v15 }
 0x10f   : > { %v1454_v22 = vmax.f32 %v1326_v18, %v1390_v20  ;;  %v1359_v23 = vmul.f32 0.2, %v1295_v21  ;;  %v789_v24 = vpop.f32.mrf.mxu2 }
 0x110   : > { %v1232_v25 = vpop.f32.mrf.mxu3 }
 0x111   : > { %v1518_v26 = vpack.c.bf16 %v1454_v22, %v1454_v22  ;;  %v1423_v27 = vmax.f32 %v1295_v21, %v1359_v23  ;;  %v1233_v28 = vadd.f32 %v1232_v25, %v789_v24  ;;  %v711_v29 = vpop.f32.mrf.mxu0 }
 0x112   : > { %v1154_v30 = vpop.f32.mrf.mxu1 }
 0x113   : > { %1583 = vst.msk [vmem:[%s2263_s20 + $0xb4] sm:$0xf] %vm1537_vm2, %v1518_v26  ;;  %v1487_v31 = vpack.c.bf16 %v1423_v27, %v1423_v27  ;;  %v1327_v32 = vadd.f32 %v2250_v47, %v1233_v28  ;;  %v1155_v33 = vadd.f32 %v1154_v30, %v711_v29 }
 0x115   : > { %1552 = vst.msk [vmem:[%s2263_s20 + $0x38] sm:$0xf] %vm1537_vm2, %v1487_v31  ;;  %v1391_v34 = vmul.f32 0.2, %v1327_v32  ;;  %v1296_v35 = vadd.f32 %v2250_v47, %v1155_v33 }
 0x117   : > { %v1455_v36 = vmax.f32 %v1327_v32, %v1391_v34  ;;  %v1360_v37 = vmul.f32 0.2, %v1296_v35  ;;  %v791_v38 = vpop.f32.mrf.mxu2 }
 0x118   : > { %v1234_v39 = vpop.f32.mrf.mxu3 }
 0x119   : > { %v1519_v40 = vpack.c.bf16 %v1455_v36, %v1455_v36  ;;  %v1424_v41 = vmax.f32 %v1296_v35, %v1360_v37  ;;  %v1235_v42 = vadd.f32 %v1234_v39, %v791_v38  ;;  %v714_v43 = vpop.f32.mrf.mxu0 }
 0x11a   : > { %v1157_v44 = vpop.f32.mrf.mxu1 }
 0x11b   : > { %1584 = vst.msk [vmem:[%s2263_s20 + $0xb8] sm:$0xf] %vm1537_vm2, %v1519_v40  ;;  %v1488_v45 = vpack.c.bf16 %v1424_v41, %v1424_v41  ;;  %v1328_v46 = vadd.f32 %v2250_v47, %v1235_v42  ;;  %v1158_v48 = vadd.f32 %v1157_v44, %v714_v43 }
 0x11d   : > { %1553 = vst.msk [vmem:[%s2263_s20 + $0x3c] sm:$0xf] %vm1537_vm2, %v1488_v45  ;;  %v1392_v49 = vmul.f32 0.2, %v1328_v46  ;;  %v1297_v50 = vadd.f32 %v2250_v47, %v1158_v48 }
 0x11f   : > { %v1456_v51 = vmax.f32 %v1328_v46, %v1392_v49  ;;  %v1361_v52 = vmul.f32 0.2, %v1297_v50  ;;  %v794_v53 = vpop.f32.mrf.mxu2 }
 0x120   : > { %v1237_v54 = vpop.f32.mrf.mxu3 }
 0x121   : > { %v1520_v55 = vpack.c.bf16 %v1456_v51, %v1456_v51  ;;  %v1425_v56 = vmax.f32 %v1297_v50, %v1361_v52  ;;  %v1238_v57 = vadd.f32 %v1237_v54, %v794_v53  ;;  %v716_v58 = vpop.f32.mrf.mxu0 }
 0x122   : > { %v1159_v59 = vpop.f32.mrf.mxu1 }
 0x123   : > { %1585 = vst.msk [vmem:[%s2263_s20 + $0xbc] sm:$0xf] %vm1537_vm2, %v1520_v55  ;;  %v1489_v60 = vpack.c.bf16 %v1425_v56, %v1425_v56  ;;  %v1329_v61 = vadd.f32 %v2250_v47, %v1238_v57  ;;  %v1160_v62 = vadd.f32 %v1159_v59, %v716_v58 }
 0x125   : > { %1554 = vst.msk [vmem:[%s2263_s20 + $0x40] sm:$0xf] %vm1537_vm2, %v1489_v60  ;;  %v1393_v63 = vmul.f32 0.2, %v1329_v61  ;;  %v1298_v0 = vadd.f32 %v2250_v47, %v1160_v62 }
 0x127   : > { %v1457_v1 = vmax.f32 %v1329_v61, %v1393_v63  ;;  %v1362_v2 = vmul.f32 0.2, %v1298_v0  ;;  %v796_v3 = vpop.f32.mrf.mxu2 }
 0x128   : > { %v1239_v4 = vpop.f32.mrf.mxu3 }
 0x129   : > { %v1521_v5 = vpack.c.bf16 %v1457_v1, %v1457_v1  ;;  %v1426_v6 = vmax.f32 %v1298_v0, %v1362_v2  ;;  %v1240_v7 = vadd.f32 %v1239_v4, %v796_v3  ;;  %v719_v8 = vpop.f32.mrf.mxu0 }
 0x12a   : > { %v1162_v9 = vpop.f32.mrf.mxu1 }
 0x12b   : > { %1586 = vst.msk [vmem:[%s2263_s20 + $0xc0] sm:$0xf] %vm1537_vm2, %v1521_v5  ;;  %v1490_v10 = vpack.c.bf16 %v1426_v6, %v1426_v6  ;;  %v1330_v11 = vadd.f32 %v2250_v47, %v1240_v7  ;;  %v1163_v12 = vadd.f32 %v1162_v9, %v719_v8 }
 0x12d   : > { %1555 = vst.msk [vmem:[%s2263_s20 + $0x44] sm:$0xf] %vm1537_vm2, %v1490_v10  ;;  %v1394_v13 = vmul.f32 0.2, %v1330_v11  ;;  %v1299_v14 = vadd.f32 %v2250_v47, %v1163_v12 }
 0x12f   : > { %v1458_v15 = vmax.f32 %v1330_v11, %v1394_v13  ;;  %v1363_v16 = vmul.f32 0.2, %v1299_v14  ;;  %v799_v17 = vpop.f32.mrf.mxu2 }
 0x130   : > { %v1242_v18 = vpop.f32.mrf.mxu3 }
 0x131   : > { %v1522_v19 = vpack.c.bf16 %v1458_v15, %v1458_v15  ;;  %v1427_v20 = vmax.f32 %v1299_v14, %v1363_v16  ;;  %v1243_v21 = vadd.f32 %v1242_v18, %v799_v17  ;;  %v721_v22 = vpop.f32.mrf.mxu0 }
 0x132   : > { %v1164_v23 = vpop.f32.mrf.mxu1 }
 0x133   : > { %1587 = vst.msk [vmem:[%s2263_s20 + $0xc4] sm:$0xf] %vm1537_vm2, %v1522_v19  ;;  %v1491_v24 = vpack.c.bf16 %v1427_v20, %v1427_v20  ;;  %v1331_v25 = vadd.f32 %v2250_v47, %v1243_v21  ;;  %v1165_v26 = vadd.f32 %v1164_v23, %v721_v22 }
 0x135   : > { %1556 = vst.msk [vmem:[%s2263_s20 + $0x48] sm:$0xf] %vm1537_vm2, %v1491_v24  ;;  %v1395_v27 = vmul.f32 0.2, %v1331_v25  ;;  %v1300_v28 = vadd.f32 %v2250_v47, %v1165_v26 }
 0x137   : > { %v1459_v29 = vmax.f32 %v1331_v25, %v1395_v27  ;;  %v1364_v30 = vmul.f32 0.2, %v1300_v28  ;;  %v801_v31 = vpop.f32.mrf.mxu2 }
 0x138   : > { %v1244_v32 = vpop.f32.mrf.mxu3 }
 0x139   : > { %v1523_v33 = vpack.c.bf16 %v1459_v29, %v1459_v29  ;;  %v1428_v34 = vmax.f32 %v1300_v28, %v1364_v30  ;;  %v1245_v35 = vadd.f32 %v1244_v32, %v801_v31  ;;  %v724_v36 = vpop.f32.mrf.mxu0 }
 0x13a   : > { %v1167_v37 = vpop.f32.mrf.mxu1 }
 0x13b   : > { %1588 = vst.msk [vmem:[%s2263_s20 + $0xc8] sm:$0xf] %vm1537_vm2, %v1523_v33  ;;  %v1492_v38 = vpack.c.bf16 %v1428_v34, %v1428_v34  ;;  %v1332_v39 = vadd.f32 %v2250_v47, %v1245_v35  ;;  %v1168_v40 = vadd.f32 %v1167_v37, %v724_v36 }
 0x13d   : > { %1557 = vst.msk [vmem:[%s2263_s20 + $0x4c] sm:$0xf] %vm1537_vm2, %v1492_v38  ;;  %v1396_v41 = vmul.f32 0.2, %v1332_v39  ;;  %v1301_v42 = vadd.f32 %v2250_v47, %v1168_v40 }
 0x13f   : > { %v1460_v43 = vmax.f32 %v1332_v39, %v1396_v41  ;;  %v1365_v44 = vmul.f32 0.2, %v1301_v42  ;;  %v804_v45 = vpop.f32.mrf.mxu2 }
 0x140   : > { %v1247_v46 = vpop.f32.mrf.mxu3 }
 0x141   : > { %v1524_v48 = vpack.c.bf16 %v1460_v43, %v1460_v43  ;;  %v1429_v49 = vmax.f32 %v1301_v42, %v1365_v44  ;;  %v1248_v50 = vadd.f32 %v1247_v46, %v804_v45  ;;  %v726_v51 = vpop.f32.mrf.mxu0 }
 0x142   : > { %v1169_v52 = vpop.f32.mrf.mxu1 }
 0x143   : > { %1589 = vst.msk [vmem:[%s2263_s20 + $0xcc] sm:$0xf] %vm1537_vm2, %v1524_v48  ;;  %v1493_v53 = vpack.c.bf16 %v1429_v49, %v1429_v49  ;;  %v1333_v54 = vadd.f32 %v2250_v47, %v1248_v50  ;;  %v1170_v55 = vadd.f32 %v1169_v52, %v726_v51 }
 0x145   : > { %1558 = vst.msk [vmem:[%s2263_s20 + $0x50] sm:$0xf] %vm1537_vm2, %v1493_v53  ;;  %v1397_v56 = vmul.f32 0.2, %v1333_v54  ;;  %v1302_v57 = vadd.f32 %v2250_v47, %v1170_v55 }
 0x147   : > { %v1461_v58 = vmax.f32 %v1333_v54, %v1397_v56  ;;  %v1366_v59 = vmul.f32 0.2, %v1302_v57  ;;  %v806_v60 = vpop.f32.mrf.mxu2 }
 0x148   : > { %v1249_v61 = vpop.f32.mrf.mxu3 }
 0x149   : > { %v1525_v62 = vpack.c.bf16 %v1461_v58, %v1461_v58  ;;  %v1430_v63 = vmax.f32 %v1302_v57, %v1366_v59  ;;  %v1250_v0 = vadd.f32 %v1249_v61, %v806_v60  ;;  %v729_v1 = vpop.f32.mrf.mxu0 }
 0x14a   : > { %v1172_v2 = vpop.f32.mrf.mxu1 }
 0x14b   : > { %1590 = vst.msk [vmem:[%s2263_s20 + $0xd0] sm:$0xf] %vm1537_vm2, %v1525_v62  ;;  %v1494_v3 = vpack.c.bf16 %v1430_v63, %v1430_v63  ;;  %v1334_v4 = vadd.f32 %v2250_v47, %v1250_v0  ;;  %v1173_v5 = vadd.f32 %v1172_v2, %v729_v1 }
 0x14d   : > { %1559 = vst.msk [vmem:[%s2263_s20 + $0x54] sm:$0xf] %vm1537_vm2, %v1494_v3  ;;  %v1398_v6 = vmul.f32 0.2, %v1334_v4  ;;  %v1303_v7 = vadd.f32 %v2250_v47, %v1173_v5 }
 0x14f   : > { %v1462_v8 = vmax.f32 %v1334_v4, %v1398_v6  ;;  %v1367_v9 = vmul.f32 0.2, %v1303_v7  ;;  %v809_v10 = vpop.f32.mrf.mxu2 }
 0x150   : > { %v1252_v11 = vpop.f32.mrf.mxu3 }
 0x151   : > { %v1526_v12 = vpack.c.bf16 %v1462_v8, %v1462_v8  ;;  %v1431_v13 = vmax.f32 %v1303_v7, %v1367_v9  ;;  %v1253_v14 = vadd.f32 %v1252_v11, %v809_v10  ;;  %v731_v15 = vpop.f32.mrf.mxu0 }
 0x152   : > { %v1174_v16 = vpop.f32.mrf.mxu1 }
 0x153   : > { %1591 = vst.msk [vmem:[%s2263_s20 + $0xd4] sm:$0xf] %vm1537_vm2, %v1526_v12  ;;  %v1495_v17 = vpack.c.bf16 %v1431_v13, %v1431_v13  ;;  %v1335_v18 = vadd.f32 %v2250_v47, %v1253_v14  ;;  %v1175_v19 = vadd.f32 %v1174_v16, %v731_v15 }
 0x155   : > { %1560 = vst.msk [vmem:[%s2263_s20 + $0x58] sm:$0xf] %vm1537_vm2, %v1495_v17  ;;  %v1399_v20 = vmul.f32 0.2, %v1335_v18  ;;  %v1304_v21 = vadd.f32 %v2250_v47, %v1175_v19 }
 0x157   : > { %v1463_v22 = vmax.f32 %v1335_v18, %v1399_v20  ;;  %v1368_v23 = vmul.f32 0.2, %v1304_v21  ;;  %v811_v24 = vpop.f32.mrf.mxu2 }
 0x158   : > { %v1254_v25 = vpop.f32.mrf.mxu3 }
 0x159   : > { %v1527_v26 = vpack.c.bf16 %v1463_v22, %v1463_v22  ;;  %v1432_v27 = vmax.f32 %v1304_v21, %v1368_v23  ;;  %v1255_v28 = vadd.f32 %v1254_v25, %v811_v24  ;;  %v734_v29 = vpop.f32.mrf.mxu0 }
 0x15a   : > { %v1177_v30 = vpop.f32.mrf.mxu1 }
 0x15b   : > { %1592 = vst.msk [vmem:[%s2263_s20 + $0xd8] sm:$0xf] %vm1537_vm2, %v1527_v26  ;;  %v1496_v31 = vpack.c.bf16 %v1432_v27, %v1432_v27  ;;  %v1336_v32 = vadd.f32 %v2250_v47, %v1255_v28  ;;  %v1178_v33 = vadd.f32 %v1177_v30, %v734_v29  ;;  %v2102_v28 = vld [vmem:[%s2514_s4] ss:$0 sm:$0xff] }
 0x15d   : > { %1561 = vst.msk [vmem:[%s2263_s20 + $0x5c] sm:$0xf] %vm1537_vm2, %v1496_v31  ;;  %v1400_v34 = vmul.f32 0.2, %v1336_v32  ;;  %v1305_v35 = vadd.f32 %v2250_v47, %v1178_v33 }
 0x15f   : > { %v1464_v36 = vmax.f32 %v1336_v32, %v1400_v34  ;;  %v1369_v37 = vmul.f32 0.2, %v1305_v35  ;;  %v814_v38 = vpop.f32.mrf.mxu2 }
 0x160   : > { %v1257_v39 = vpop.f32.mrf.mxu3 }
 0x161   : > { %v1528_v40 = vpack.c.bf16 %v1464_v36, %v1464_v36  ;;  %v1433_v41 = vmax.f32 %v1305_v35, %v1369_v37  ;;  %v1258_v42 = vadd.f32 %v1257_v39, %v814_v38  ;;  %v736_v43 = vpop.f32.mrf.mxu0 }
 0x162   : > { %v1179_v44 = vpop.f32.mrf.mxu1 }
 0x163   : > { %1593 = vst.msk [vmem:[%s2263_s20 + $0xdc] sm:$0xf] %vm1537_vm2, %v1528_v40  ;;  %v1497_v45 = vpack.c.bf16 %v1433_v41, %v1433_v41  ;;  %v1337_v46 = vadd.f32 %v2250_v47, %v1258_v42  ;;  %v1180_v48 = vadd.f32 %v1179_v44, %v736_v43 }
 0x165   : > { %1562 = vst.msk [vmem:[%s2263_s20 + $0x60] sm:$0xf] %vm1537_vm2, %v1497_v45  ;;  %v1401_v49 = vmul.f32 0.2, %v1337_v46  ;;  %v1306_v50 = vadd.f32 %v2250_v47, %v1180_v48 }
 0x167   : > { %v1465_v51 = vmax.f32 %v1337_v46, %v1401_v49  ;;  %v1370_v52 = vmul.f32 0.2, %v1306_v50  ;;  %v816_v53 = vpop.f32.mrf.mxu2 }
 0x168   : > { %v1259_v54 = vpop.f32.mrf.mxu3 }
 0x169   : > { %v1529_v55 = vpack.c.bf16 %v1465_v51, %v1465_v51  ;;  %v1434_v56 = vmax.f32 %v1306_v50, %v1370_v52  ;;  %v1260_v57 = vadd.f32 %v1259_v54, %v816_v53  ;;  %v739_v58 = vpop.f32.mrf.mxu0 }
 0x16a   : > { %v1182_v59 = vpop.f32.mrf.mxu1 }
 0x16b   : > { %1594 = vst.msk [vmem:[%s2263_s20 + $0xe0] sm:$0xf] %vm1537_vm2, %v1529_v55  ;;  %v1498_v60 = vpack.c.bf16 %v1434_v56, %v1434_v56  ;;  %v1338_v61 = vadd.f32 %v2250_v47, %v1260_v57  ;;  %v1183_v62 = vadd.f32 %v1182_v59, %v739_v58 }
 0x16d   : > { %1563 = vst.msk [vmem:[%s2263_s20 + $0x64] sm:$0xf] %vm1537_vm2, %v1498_v60  ;;  %v1402_v63 = vmul.f32 0.2, %v1338_v61  ;;  %v1307_v0 = vadd.f32 %v2250_v47, %v1183_v62 }
 0x16f   : > { %v1466_v1 = vmax.f32 %v1338_v61, %v1402_v63  ;;  %v1371_v2 = vmul.f32 0.2, %v1307_v0  ;;  %v819_v3 = vpop.f32.mrf.mxu2 }
 0x170   : > { %v1262_v4 = vpop.f32.mrf.mxu3 }
 0x171   : > { %v1530_v5 = vpack.c.bf16 %v1466_v1, %v1466_v1  ;;  %v1435_v6 = vmax.f32 %v1307_v0, %v1371_v2  ;;  %v1263_v7 = vadd.f32 %v1262_v4, %v819_v3  ;;  %v741_v8 = vpop.f32.mrf.mxu0 }
 0x172   : > { %v1184_v9 = vpop.f32.mrf.mxu1 }
 0x173   : > { %1595 = vst.msk [vmem:[%s2263_s20 + $0xe4] sm:$0xf] %vm1537_vm2, %v1530_v5  ;;  %v1499_v10 = vpack.c.bf16 %v1435_v6, %v1435_v6  ;;  %v1339_v11 = vadd.f32 %v2250_v47, %v1263_v7  ;;  %v1185_v12 = vadd.f32 %v1184_v9, %v741_v8 }
 0x175   : > { %1564 = vst.msk [vmem:[%s2263_s20 + $0x68] sm:$0xf] %vm1537_vm2, %v1499_v10  ;;  %v1403_v13 = vmul.f32 0.2, %v1339_v11  ;;  %v1308_v14 = vadd.f32 %v2250_v47, %v1185_v12 }
 0x177   : > { %v1467_v15 = vmax.f32 %v1339_v11, %v1403_v13  ;;  %v1372_v16 = vmul.f32 0.2, %v1308_v14  ;;  %v821_v17 = vpop.f32.mrf.mxu2 }
 0x178   : > { %v1264_v18 = vpop.f32.mrf.mxu3 }
 0x179   : > { %v1531_v19 = vpack.c.bf16 %v1467_v15, %v1467_v15  ;;  %v1436_v20 = vmax.f32 %v1308_v14, %v1372_v16  ;;  %v1265_v21 = vadd.f32 %v1264_v18, %v821_v17  ;;  %v744_v22 = vpop.f32.mrf.mxu0 }
 0x17a   : > { %v1187_v23 = vpop.f32.mrf.mxu1 }
 0x17b   : > { %1596 = vst.msk [vmem:[%s2263_s20 + $0xe8] sm:$0xf] %vm1537_vm2, %v1531_v19  ;;  %v1500_v24 = vpack.c.bf16 %v1436_v20, %v1436_v20  ;;  %v1340_v25 = vadd.f32 %v2250_v47, %v1265_v21  ;;  %v1188_v26 = vadd.f32 %v1187_v23, %v744_v22 }
 0x17d   : > { %1565 = vst.msk [vmem:[%s2263_s20 + $0x6c] sm:$0xf] %vm1537_vm2, %v1500_v24  ;;  %v1404_v27 = vmul.f32 0.2, %v1340_v25  ;;  %v1309_v29 = vadd.f32 %v2102_v28, %v1188_v26 }
 0x17f   : > { %v1468_v30 = vmax.f32 %v1340_v25, %v1404_v27  ;;  %v1373_v31 = vmul.f32 0.2, %v1309_v29  ;;  %v824_v32 = vpop.f32.mrf.mxu2 }
 0x180   : > { %v1267_v33 = vpop.f32.mrf.mxu3 }
 0x181   : > { %v1532_v34 = vpack.c.bf16 %v1468_v30, %v1468_v30  ;;  %v1437_v35 = vmax.f32 %v1309_v29, %v1373_v31  ;;  %v1268_v36 = vadd.f32 %v1267_v33, %v824_v32  ;;  %v746_v37 = vpop.f32.mrf.mxu0 }
 0x182   : > { %v1189_v38 = vpop.f32.mrf.mxu1 }
 0x183   : > { %1597 = vst.msk [vmem:[%s2263_s20 + $0xec] sm:$0xf] %vm1537_vm2, %v1532_v34  ;;  %v1501_v47 = vpack.c.bf16 %v1437_v35, %v1437_v35  ;;  %v1341_v39 = vadd.f32 %v2102_v28, %v1268_v36  ;;  %v1190_v40 = vadd.f32 %v1189_v38, %v746_v37 }
 0x185   : > { %1566 = vst.msk [vmem:[%s2263_s20 + $0x70] sm:$0xf] %vm1537_vm2, %v1501_v47  ;;  %v1405_v41 = vmul.f32 0.2, %v1341_v39  ;;  %v1310_v42 = vadd.f32 %v2102_v28, %v1190_v40 }
 0x187   : > { %v1469_v43 = vmax.f32 %v1341_v39, %v1405_v41  ;;  %v1374_v44 = vmul.f32 0.2, %v1310_v42  ;;  %v826_v45 = vpop.f32.mrf.mxu2 }
 0x188   : > { %v1269_v46 = vpop.f32.mrf.mxu3 }
 0x189   : > { %v1533_v48 = vpack.c.bf16 %v1469_v43, %v1469_v43  ;;  %v1438_v49 = vmax.f32 %v1310_v42, %v1374_v44  ;;  %v1270_v50 = vadd.f32 %v1269_v46, %v826_v45  ;;  %v749_v51 = vpop.f32.mrf.mxu0 }
 0x18a   : > { %v1192_v52 = vpop.f32.mrf.mxu1 }
 0x18b   : > { %1598 = vst.msk [vmem:[%s2263_s20 + $0xf0] sm:$0xf] %vm1537_vm2, %v1533_v48  ;;  %v1502_v53 = vpack.c.bf16 %v1438_v49, %v1438_v49  ;;  %v1342_v54 = vadd.f32 %v2102_v28, %v1270_v50  ;;  %v1193_v55 = vadd.f32 %v1192_v52, %v749_v51 }
 0x18d   : > { %1567 = vst.msk [vmem:[%s2263_s20 + $0x74] sm:$0xf] %vm1537_vm2, %v1502_v53  ;;  %v1406_v56 = vmul.f32 0.2, %v1342_v54  ;;  %v1311_v57 = vadd.f32 %v2102_v28, %v1193_v55 }
 0x18f   : > { %v1470_v58 = vmax.f32 %v1342_v54, %v1406_v56  ;;  %v1375_v59 = vmul.f32 0.2, %v1311_v57  ;;  %v829_v60 = vpop.f32.mrf.mxu2 }
 0x190   : > { %v1272_v61 = vpop.f32.mrf.mxu3 }
 0x191   : > { %v1534_v62 = vpack.c.bf16 %v1470_v58, %v1470_v58  ;;  %v1439_v63 = vmax.f32 %v1311_v57, %v1375_v59  ;;  %v1273_v0 = vadd.f32 %v1272_v61, %v829_v60  ;;  %v751_v1 = vpop.f32.mrf.mxu0 }
 0x192   : > { %v1194_v2 = vpop.f32.mrf.mxu1 }
 0x193   : > { %1599 = vst.msk [vmem:[%s2263_s20 + $0xf4] sm:$0xf] %vm1537_vm2, %v1534_v62  ;;  %v1503_v3 = vpack.c.bf16 %v1439_v63, %v1439_v63  ;;  %v1343_v4 = vadd.f32 %v2102_v28, %v1273_v0  ;;  %v1195_v5 = vadd.f32 %v1194_v2, %v751_v1 }
 0x195   : > { %1568 = vst.msk [vmem:[%s2263_s20 + $0x78] sm:$0xf] %vm1537_vm2, %v1503_v3  ;;  %v1407_v6 = vmul.f32 0.2, %v1343_v4  ;;  %v1312_v7 = vadd.f32 %v2102_v28, %v1195_v5 }
 0x197   : > { %v1471_v8 = vmax.f32 %v1343_v4, %v1407_v6  ;;  %v1376_v9 = vmul.f32 0.2, %v1312_v7  ;;  %v831_v10 = vpop.f32.mrf.mxu2 }
 0x198   : > { %v1274_v11 = vpop.f32.mrf.mxu3 }
 0x199   : > { %v1535_v12 = vpack.c.bf16 %v1471_v8, %v1471_v8  ;;  %v1440_v13 = vmax.f32 %v1312_v7, %v1376_v9  ;;  %v1275_v14 = vadd.f32 %v1274_v11, %v831_v10 }
 0x19b   : > { %1600 = vst.msk [vmem:[%s2263_s20 + $0xf8] sm:$0xf] %vm1537_vm2, %v1535_v12  ;;  %v1504_v15 = vpack.c.bf16 %v1440_v13, %v1440_v13  ;;  %v1344_v16 = vadd.f32 %v2102_v28, %v1275_v14 }
 0x19d   : > { %1569 = vst.msk [vmem:[%s2263_s20 + $0x7c] sm:$0xf] %vm1537_vm2, %v1504_v15  ;;  %v1408_v17 = vmul.f32 0.2, %v1344_v16 }
 0x19f   : > { %v1472_v18 = vmax.f32 %v1344_v16, %v1408_v17 }
 0x1a1   : > { %v1536_v19 = vpack.c.bf16 %v1472_v18, %v1472_v18 }
 0x1a3   : > { %1601 = vst.msk [vmem:[%s2263_s20 + $0xfc] sm:$0xf] %vm1537_vm2, %v1536_v19 }
 0x1a4 PF: > { %s15_s18 = sadd.s32 1, %s2109_s18  }
 0x1a5   : > { %p12_p4 = scmp.ge.s32.totalorder %s15_s18, 6  }
 0x1a7   :  { %14 = sbr.rel (!%p12_p4) target bundleno = 1 (0x1), region = 73 }

// kernel: _lambda_.5
= control target key start
LH: loop header
LB: loop body
LE: loop exit
PB: predicated region body
PF: predicated region fallthrough
CT: control target
= control target key end

     0   :  { %s1201_s12 = smov 0   ;;  %s1496_s0 = inlined_call_operand.vmem [shape: bf16[2048,36], index: 0, kind: input, shape index: {}]   ;;  %s1497_s1 = inlined_call_operand.vmem [shape: bf16[36,4], index: 1, kind: input, shape index: {}]   ;;  %s1498_s2 = inlined_call_operand.vmem [shape: f32[1,4], index: 2, kind: input, shape index: {}]   ;;  %s1499_s3 = inlined_call_operand.vmem [shape: f32[2048,4], index: 3, kind: output, shape index: {}]  }
   0x1 LB: > { %s942_s13 = sadd.s32 4294967295, %s1179_s12   ;;  %p946_p0 = scmp.ge.s32.totalorder %s1179_s12, 1  ;;  %s1179_s12 = sphi %s1201_s12, %s13_s12  }
   0x2   : > { %p138_p1 = scmp.lt.s32.totalorder %s1179_s12, 5 }
   0x4   : > { %p139_p2 = pnand %p946_p0, %p138_p1 }
   0x5   : > { %s947_s16 = sshll.u32 (!%p139_p2), %s942_s13, 6 }
   0x6   : > { %142 = sbr.rel (%p139_p2) target bundleno = 289 (0x121), region = 32  ;;  %p163_p3 = scmp.lt.s32.totalorder (!%p139_p2), %s947_s16, 255 }
   0xb   : > { %v243_v0 = vld [vmem:[%s1497_s1 + $0x10] sm:$0x3]  ;;  %vm520_vm0 = vcmask 1041408   ;;  %s1501_s16 = smov (!%p163_p3, %s947_s16), 255  ;;  %v1154_v4 = vld [vmem:[%s1497_s1 + $0x8] sm:$0xff]  ;;  %v1153_v5 = vld [vmem:[%s1497_s1] sm:$0xff] }
   0xc   : > { %v417_v1 = vunpack.c.l.b16 %v243_v0  ;;  %s948_s19 = sshll.u32 %s1501_s16, 2  ;;  %vm423_vm1 = vcmask 293888   ;;  %v1293_v38 = vld [vmem:[%s1498_s2] ss:$0 sm:$0xff]  ;;  %s950_s27 = sshll.u32 %s1501_s16, 3  ;;  %vm821_vm2 = vcmask 31744  }
   0xd   : > { %s1224_s24 = scalar_lea.vmem %s1496_s0, %s948_s19  ;;  %s1301_s30 = scalar_lea.vmem %s1499_s3, %s950_s27 }
   0xe   : > { %v420_v2 = vpack.c.b16 %v417_v1, %v417_v1  ;;  %v1121_v6 = vld [vmem:[%s1224_s24] sm:$0xff]  ;;  %v1122_v10 = vld [vmem:[%s1224_s24 + $0x8] sm:$0xff]  ;;  %v1123_v14 = vld [vmem:[%s1224_s24 + $0x10] sm:$0xff] }
   0xf   : > { %v1129_v7 = vld [vmem:[%s1224_s24 + $0x40] sm:$0xff]  ;;  %v1130_v11 = vld [vmem:[%s1224_s24 + $0x48] sm:$0xff]  ;;  %v1131_v15 = vld [vmem:[%s1224_s24 + $0x50] sm:$0xff] }
  0x10   : > { %v522_v3 = vsel %vm520_vm0, %v420_v2, 0  ;;  %v1137_v8 = vld [vmem:[%s1224_s24 + $0x80] sm:$0xff]  ;;  %v1138_v12 = vld [vmem:[%s1224_s24 + $0x88] sm:$0xff]  ;;  %v1139_v16 = vld [vmem:[%s1224_s24 + $0x90] sm:$0xff] }
  0x11   : > { %529 = vmatpush.bf16.msra.mxu0 %v522_v3  ;;  %1155 = vmatpush.bf16.msra.mxu1 %v522_v3  ;;  %v1145_v9 = vld [vmem:[%s1224_s24 + $0xc0] sm:$0xff]  ;;  %v1146_v13 = vld [vmem:[%s1224_s24 + $0xc8] sm:$0xff]  ;;  %v1147_v17 = vld [vmem:[%s1224_s24 + $0xd0] sm:$0xff] }
  0x12   : > { %1156 = vmatpush.bf16.msra.mxu2 %v522_v3  ;;  %1157 = vmatpush.bf16.msra.mxu3 %v522_v3  ;;  %v1124_v18 = vld [vmem:[%s1224_s24 + $0x18] sm:$0xff]  ;;  %v1125_v22 = vld [vmem:[%s1224_s24 + $0x20] sm:$0xff]  ;;  %v1126_v26 = vld [vmem:[%s1224_s24 + $0x28] sm:$0xff] }
  0x13   : > { %v1132_v19 = vld [vmem:[%s1224_s24 + $0x58] sm:$0xff]  ;;  %v1133_v23 = vld [vmem:[%s1224_s24 + $0x60] sm:$0xff]  ;;  %v1134_v27 = vld [vmem:[%s1224_s24 + $0x68] sm:$0xff] }
  0x14   : > { %v1140_v20 = vld [vmem:[%s1224_s24 + $0x98] sm:$0xff]  ;;  %v1141_v24 = vld [vmem:[%s1224_s24 + $0xa0] sm:$0xff]  ;;  %v1142_v28 = vld [vmem:[%s1224_s24 + $0xa8] sm:$0xff] }
  0x15   : > { %530 = vmatpush.bf16.msra.mxu0 %v1154_v4  ;;  %1158 = vmatpush.bf16.msra.mxu1 %v1154_v4  ;;  %v1148_v21 = vld [vmem:[%s1224_s24 + $0xd8] sm:$0xff]  ;;  %v1149_v25 = vld [vmem:[%s1224_s24 + $0xe0] sm:$0xff]  ;;  %v1150_v29 = vld [vmem:[%s1224_s24 + $0xe8] sm:$0xff] }
  0x16   : > { %1159 = vmatpush.bf16.msra.mxu2 %v1154_v4  ;;  %1160 = vmatpush.bf16.msra.mxu3 %v1154_v4  ;;  %v1127_v30 = vld [vmem:[%s1224_s24 + $0x30] sm:$0xff]  ;;  %v1128_v34 = vld [vmem:[%s1224_s24 + $0x38] sm:$0xff] }
  0x17   : > { %v1135_v31 = vld [vmem:[%s1224_s24 + $0x70] sm:$0xff]  ;;  %v1136_v35 = vld [vmem:[%s1224_s24 + $0x78] sm:$0xff] }
  0x18   : > { %v1143_v32 = vld [vmem:[%s1224_s24 + $0xb0] sm:$0xff]  ;;  %v1144_v36 = vld [vmem:[%s1224_s24 + $0xb8] sm:$0xff] }
  0x19   : > { %531 = vmatpush.bf16.msra.mxu0 %v1153_v5  ;;  %1161 = vmatpush.bf16.msra.mxu1 %v1153_v5  ;;  %v1151_v33 = vld [vmem:[%s1224_s24 + $0xf0] sm:$0xff]  ;;  %v1152_v37 = vld [vmem:[%s1224_s24 + $0xf8] sm:$0xff] }
  0x1a   : > { %1162 = vmatpush.bf16.msra.mxu2 %v1153_v5  ;;  %1163 = vmatpush.bf16.msra.mxu3 %v1153_v5 }
  0x1c   : > { %1087 = vmatmul.msk.bf16.vlgmr.msra.gmra.mxu0 %vm423_vm1, %v1121_v6  ;;  %1095 = vmatmul.msk.bf16.vlgmr.msra.gmra.mxu1 %vm423_vm1, %v1129_v7 }
  0x1d   : > { %1103 = vmatmul.msk.bf16.vlgmr.msra.gmra.mxu2 %vm423_vm1, %v1137_v8  ;;  %1111 = vmatmul.msk.bf16.vlgmr.msra.gmra.mxu3 %vm423_vm1, %v1145_v9 }
  0x2c   : > { %1088 = vmatmul.msk.bf16.gmra.mxu0 %vm423_vm1, %v1122_v10  ;;  %1096 = vmatmul.msk.bf16.gmra.mxu1 %vm423_vm1, %v1130_v11 }
  0x2d   : > { %1104 = vmatmul.msk.bf16.gmra.mxu2 %vm423_vm1, %v1138_v12  ;;  %1112 = vmatmul.msk.bf16.gmra.mxu3 %vm423_vm1, %v1146_v13 }
  0x3c   : > { %1089 = vmatmul.msk.bf16.gmra.mxu0 %vm423_vm1, %v1123_v14  ;;  %1097 = vmatmul.msk.bf16.gmra.mxu1 %vm423_vm1, %v1131_v15 }
  0x3d   : > { %1105 = vmatmul.msk.bf16.gmra.mxu2 %vm423_vm1, %v1139_v16  ;;  %1113 = vmatmul.msk.bf16.gmra.mxu3 %vm423_vm1, %v1147_v17 }
  0x4c   : > { %1090 = vmatmul.msk.bf16.gmra.mxu0 %vm423_vm1, %v1124_v18  ;;  %1098 = vmatmul.msk.bf16.gmra.mxu1 %vm423_vm1, %v1132_v19 }
  0x4d   : > { %1106 = vmatmul.msk.bf16.gmra.mxu2 %vm423_vm1, %v1140_v20  ;;  %1114 = vmatmul.msk.bf16.gmra.mxu3 %vm423_vm1, %v1148_v21 }
  0x5c   : > { %1091 = vmatmul.msk.bf16.gmra.mxu0 %vm423_vm1, %v1125_v22  ;;  %1099 = vmatmul.msk.bf16.gmra.mxu1 %vm423_vm1, %v1133_v23 }
  0x5d   : > { %1107 = vmatmul.msk.bf16.gmra.mxu2 %vm423_vm1, %v1141_v24  ;;  %1115 = vmatmul.msk.bf16.gmra.mxu3 %vm423_vm1, %v1149_v25 }
  0x6c   : > { %1092 = vmatmul.msk.bf16.gmra.mxu0 %vm423_vm1, %v1126_v26  ;;  %1100 = vmatmul.msk.bf16.gmra.mxu1 %vm423_vm1, %v1134_v27 }
  0x6d   : > { %1108 = vmatmul.msk.bf16.gmra.mxu2 %vm423_vm1, %v1142_v28  ;;  %1116 = vmatmul.msk.bf16.gmra.mxu3 %vm423_vm1, %v1150_v29 }
  0x7c   : > { %1093 = vmatmul.msk.bf16.gmra.mxu0 %vm423_vm1, %v1127_v30  ;;  %1101 = vmatmul.msk.bf16.gmra.mxu1 %vm423_vm1, %v1135_v31 }
  0x7d   : > { %1109 = vmatmul.msk.bf16.gmra.mxu2 %vm423_vm1, %v1143_v32  ;;  %1117 = vmatmul.msk.bf16.gmra.mxu3 %vm423_vm1, %v1151_v33 }
  0x8c   : > { %1094 = vmatmul.msk.bf16.gmra.mxu0 %vm423_vm1, %v1128_v34  ;;  %1102 = vmatmul.msk.bf16.gmra.mxu1 %vm423_vm1, %v1136_v35 }
  0x8d   : > { %1110 = vmatmul.msk.bf16.gmra.mxu2 %vm423_vm1, %v1144_v36  ;;  %1118 = vmatmul.msk.bf16.gmra.mxu3 %vm423_vm1, %v1152_v37 }
  0x99   : > { %v533_v39 = vpop.f32.mrf.mxu0  ;;  %v573_v40 = vpop.f32.mrf.mxu1 }
  0x9a   : > { %v534_v41 = vadd.f32 %v1293_v38, %v533_v39  ;;  %v574_v42 = vadd.f32 %v1293_v38, %v573_v40 }
  0x9c   : > { %v693_v43 = vmul.f32 0.2, %v534_v41  ;;  %v709_v44 = vmul.f32 0.2, %v574_v42 }
  0x9e   : > { %v757_v45 = vmax.f32 %v534_v41, %v693_v43  ;;  %v773_v46 = vmax.f32 %v574_v42, %v709_v44 }
  0xa0   : > { %822 = vst.msk [vmem:[%s1301_s30] sm:$0xff] %vm821_vm2, %v757_v45  ;;  %v613_v47 = vpop.f32.mrf.mxu2  ;;  %v653_v48 = vpop.f32.mrf.mxu3 }
  0xa1   : > { %838 = vst.msk [vmem:[%s1301_s30 + $0x80] sm:$0xff] %vm821_vm2, %v773_v46  ;;  %v614_v49 = vadd.f32 %v1293_v38, %v613_v47  ;;  %v654_v50 = vadd.f32 %v1293_v38, %v653_v48  ;;  %v535_v51 = vpop.f32.mrf.mxu0  ;;  %v575_v52 = vpop.f32.mrf.mxu1 }
  0xa2   : > { %v536_v53 = vadd.f32 %v1293_v38, %v535_v51  ;;  %v576_v54 = vadd.f32 %v1293_v38, %v575_v52 }
  0xa3   : > { %v725_v55 = vmul.f32 0.2, %v614_v49  ;;  %v741_v56 = vmul.f32 0.2, %v654_v50 }
  0xa4   : > { %v694_v57 = vmul.f32 0.2, %v536_v53  ;;  %v710_v58 = vmul.f32 0.2, %v576_v54 }
  0xa5   : > { %v789_v59 = vmax.f32 %v614_v49, %v725_v55  ;;  %v805_v60 = vmax.f32 %v654_v50, %v741_v56 }
  0xa6   : > { %v758_v61 = vmax.f32 %v536_v53, %v694_v57  ;;  %v774_v62 = vmax.f32 %v576_v54, %v710_v58 }
  0xa7   : > { %854 = vst.msk [vmem:[%s1301_s30 + $0x100] sm:$0xff] %vm821_vm2, %v789_v59 }
  0xa8   : > { %870 = vst.msk [vmem:[%s1301_s30 + $0x180] sm:$0xff] %vm821_vm2, %v805_v60  ;;  %v615_v63 = vpop.f32.mrf.mxu2  ;;  %v655_v0 = vpop.f32.mrf.mxu3 }
  0xa9   : > { %823 = vst.msk [vmem:[%s1301_s30 + $0x8] sm:$0xff] %vm821_vm2, %v758_v61  ;;  %v616_v1 = vadd.f32 %v1293_v38, %v615_v63  ;;  %v656_v2 = vadd.f32 %v1293_v38, %v655_v0  ;;  %v538_v3 = vpop.f32.mrf.mxu0  ;;  %v578_v4 = vpop.f32.mrf.mxu1 }
  0xaa   : > { %839 = vst.msk [vmem:[%s1301_s30 + $0x88] sm:$0xff] %vm821_vm2, %v774_v62  ;;  %v539_v5 = vadd.f32 %v1293_v38, %v538_v3  ;;  %v579_v6 = vadd.f32 %v1293_v38, %v578_v4 }
  0xab   : > { %v726_v7 = vmul.f32 0.2, %v616_v1  ;;  %v742_v8 = vmul.f32 0.2, %v656_v2 }
  0xac   : > { %v695_v9 = vmul.f32 0.2, %v539_v5  ;;  %v711_v10 = vmul.f32 0.2, %v579_v6 }
  0xad   : > { %v790_v11 = vmax.f32 %v616_v1, %v726_v7  ;;  %v806_v12 = vmax.f32 %v656_v2, %v742_v8 }
  0xae   : > { %v759_v13 = vmax.f32 %v539_v5, %v695_v9  ;;  %v775_v14 = vmax.f32 %v579_v6, %v711_v10 }
  0xaf   : > { %855 = vst.msk [vmem:[%s1301_s30 + $0x108] sm:$0xff] %vm821_vm2, %v790_v11 }
  0xb0   : > { %871 = vst.msk [vmem:[%s1301_s30 + $0x188] sm:$0xff] %vm821_vm2, %v806_v12  ;;  %v618_v15 = vpop.f32.mrf.mxu2  ;;  %v658_v16 = vpop.f32.mrf.mxu3 }
  0xb1   : > { %824 = vst.msk [vmem:[%s1301_s30 + $0x10] sm:$0xff] %vm821_vm2, %v759_v13  ;;  %v619_v17 = vadd.f32 %v1293_v38, %v618_v15  ;;  %v659_v18 = vadd.f32 %v1293_v38, %v658_v16  ;;  %v540_v19 = vpop.f32.mrf.mxu0  ;;  %v580_v20 = vpop.f32.mrf.mxu1 }
  0xb2   : > { %840 = vst.msk [vmem:[%s1301_s30 + $0x90] sm:$0xff] %vm821_vm2, %v775_v14  ;;  %v541_v21 = vadd.f32 %v1293_v38, %v540_v19  ;;  %v581_v22 = vadd.f32 %v1293_v38, %v580_v20 }
  0xb3   : > { %v727_v23 = vmul.f32 0.2, %v619_v17  ;;  %v743_v24 = vmul.f32 0.2, %v659_v18 }
  0xb4   : > { %v696_v25 = vmul.f32 0.2, %v541_v21  ;;  %v712_v26 = vmul.f32 0.2, %v581_v22 }
  0xb5   : > { %v791_v27 = vmax.f32 %v619_v17, %v727_v23  ;;  %v807_v28 = vmax.f32 %v659_v18, %v743_v24 }
  0xb6   : > { %v760_v29 = vmax.f32 %v541_v21, %v696_v25  ;;  %v776_v30 = vmax.f32 %v581_v22, %v712_v26 }
  0xb7   : > { %856 = vst.msk [vmem:[%s1301_s30 + $0x110] sm:$0xff] %vm821_vm2, %v791_v27 }
  0xb8   : > { %872 = vst.msk [vmem:[%s1301_s30 + $0x190] sm:$0xff] %vm821_vm2, %v807_v28  ;;  %v620_v31 = vpop.f32.mrf.mxu2  ;;  %v660_v32 = vpop.f32.mrf.mxu3 }
  0xb9   : > { %825 = vst.msk [vmem:[%s1301_s30 + $0x18] sm:$0xff] %vm821_vm2, %v760_v29  ;;  %v621_v33 = vadd.f32 %v1293_v38, %v620_v31  ;;  %v661_v34 = vadd.f32 %v1293_v38, %v660_v32  ;;  %v543_v35 = vpop.f32.mrf.mxu0  ;;  %v583_v36 = vpop.f32.mrf.mxu1 }
  0xba   : > { %841 = vst.msk [vmem:[%s1301_s30 + $0x98] sm:$0xff] %vm821_vm2, %v776_v30  ;;  %v544_v37 = vadd.f32 %v1293_v38, %v543_v35  ;;  %v584_v39 = vadd.f32 %v1293_v38, %v583_v36 }
  0xbb   : > { %v728_v40 = vmul.f32 0.2, %v621_v33  ;;  %v744_v41 = vmul.f32 0.2, %v661_v34 }
  0xbc   : > { %v697_v42 = vmul.f32 0.2, %v544_v37  ;;  %v713_v43 = vmul.f32 0.2, %v584_v39 }
  0xbd   : > { %v792_v44 = vmax.f32 %v621_v33, %v728_v40  ;;  %v808_v45 = vmax.f32 %v661_v34, %v744_v41 }
  0xbe   : > { %v761_v46 = vmax.f32 %v544_v37, %v697_v42  ;;  %v777_v47 = vmax.f32 %v584_v39, %v713_v43 }
  0xbf   : > { %857 = vst.msk [vmem:[%s1301_s30 + $0x118] sm:$0xff] %vm821_vm2, %v792_v44 }
  0xc0   : > { %873 = vst.msk [vmem:[%s1301_s30 + $0x198] sm:$0xff] %vm821_vm2, %v808_v45  ;;  %v623_v48 = vpop.f32.mrf.mxu2  ;;  %v663_v49 = vpop.f32.mrf.mxu3 }
  0xc1   : > { %826 = vst.msk [vmem:[%s1301_s30 + $0x20] sm:$0xff] %vm821_vm2, %v761_v46  ;;  %v624_v50 = vadd.f32 %v1293_v38, %v623_v48  ;;  %v664_v51 = vadd.f32 %v1293_v38, %v663_v49  ;;  %v545_v52 = vpop.f32.mrf.mxu0  ;;  %v585_v53 = vpop.f32.mrf.mxu1 }
  0xc2   : > { %842 = vst.msk [vmem:[%s1301_s30 + $0xa0] sm:$0xff] %vm821_vm2, %v777_v47  ;;  %v546_v54 = vadd.f32 %v1293_v38, %v545_v52  ;;  %v586_v55 = vadd.f32 %v1293_v38, %v585_v53 }
  0xc3   : > { %v729_v56 = vmul.f32 0.2, %v624_v50  ;;  %v745_v57 = vmul.f32 0.2, %v664_v51 }
  0xc4   : > { %v698_v58 = vmul.f32 0.2, %v546_v54  ;;  %v714_v59 = vmul.f32 0.2, %v586_v55 }
  0xc5   : > { %v793_v60 = vmax.f32 %v624_v50, %v729_v56  ;;  %v809_v61 = vmax.f32 %v664_v51, %v745_v57 }
  0xc6   : > { %v762_v62 = vmax.f32 %v546_v54, %v698_v58  ;;  %v778_v63 = vmax.f32 %v586_v55, %v714_v59 }
  0xc7   : > { %858 = vst.msk [vmem:[%s1301_s30 + $0x120] sm:$0xff] %vm821_vm2, %v793_v60 }
  0xc8   : > { %874 = vst.msk [vmem:[%s1301_s30 + $0x1a0] sm:$0xff] %vm821_vm2, %v809_v61  ;;  %v625_v0 = vpop.f32.mrf.mxu2  ;;  %v665_v1 = vpop.f32.mrf.mxu3 }
  0xc9   : > { %827 = vst.msk [vmem:[%s1301_s30 + $0x28] sm:$0xff] %vm821_vm2, %v762_v62  ;;  %v626_v2 = vadd.f32 %v1293_v38, %v625_v0  ;;  %v666_v3 = vadd.f32 %v1293_v38, %v665_v1  ;;  %v548_v4 = vpop.f32.mrf.mxu0  ;;  %v588_v5 = vpop.f32.mrf.mxu1 }
  0xca   : > { %843 = vst.msk [vmem:[%s1301_s30 + $0xa8] sm:$0xff] %vm821_vm2, %v778_v63  ;;  %v549_v6 = vadd.f32 %v1293_v38, %v548_v4  ;;  %v589_v7 = vadd.f32 %v1293_v38, %v588_v5 }
  0xcb   : > { %v730_v8 = vmul.f32 0.2, %v626_v2  ;;  %v746_v9 = vmul.f32 0.2, %v666_v3 }
  0xcc   : > { %v699_v10 = vmul.f32 0.2, %v549_v6  ;;  %v715_v11 = vmul.f32 0.2, %v589_v7 }
  0xcd   : > { %v794_v12 = vmax.f32 %v626_v2, %v730_v8  ;;  %v810_v13 = vmax.f32 %v666_v3, %v746_v9 }
  0xce   : > { %v763_v14 = vmax.f32 %v549_v6, %v699_v10  ;;  %v779_v15 = vmax.f32 %v589_v7, %v715_v11 }
  0xcf   : > { %859 = vst.msk [vmem:[%s1301_s30 + $0x128] sm:$0xff] %vm821_vm2, %v794_v12 }
  0xd0   : > { %875 = vst.msk [vmem:[%s1301_s30 + $0x1a8] sm:$0xff] %vm821_vm2, %v810_v13  ;;  %v628_v16 = vpop.f32.mrf.mxu2  ;;  %v668_v17 = vpop.f32.mrf.mxu3 }
  0xd1   : > { %828 = vst.msk [vmem:[%s1301_s30 + $0x30] sm:$0xff] %vm821_vm2, %v763_v14  ;;  %v629_v18 = vadd.f32 %v1293_v38, %v628_v16  ;;  %v669_v19 = vadd.f32 %v1293_v38, %v668_v17  ;;  %v550_v20 = vpop.f32.mrf.mxu0  ;;  %v590_v21 = vpop.f32.mrf.mxu1 }
  0xd2   : > { %844 = vst.msk [vmem:[%s1301_s30 + $0xb0] sm:$0xff] %vm821_vm2, %v779_v15  ;;  %v551_v22 = vadd.f32 %v1293_v38, %v550_v20  ;;  %v591_v23 = vadd.f32 %v1293_v38, %v590_v21 }
  0xd3   : > { %v731_v24 = vmul.f32 0.2, %v629_v18  ;;  %v747_v25 = vmul.f32 0.2, %v669_v19 }
  0xd4   : > { %v700_v26 = vmul.f32 0.2, %v551_v22  ;;  %v716_v27 = vmul.f32 0.2, %v591_v23 }
  0xd5   : > { %v795_v28 = vmax.f32 %v629_v18, %v731_v24  ;;  %v811_v29 = vmax.f32 %v669_v19, %v747_v25 }
  0xd6   : > { %v764_v30 = vmax.f32 %v551_v22, %v700_v26  ;;  %v780_v31 = vmax.f32 %v591_v23, %v716_v27 }
  0xd7   : > { %860 = vst.msk [vmem:[%s1301_s30 + $0x130] sm:$0xff] %vm821_vm2, %v795_v28 }
  0xd8   : > { %876 = vst.msk [vmem:[%s1301_s30 + $0x1b0] sm:$0xff] %vm821_vm2, %v811_v29  ;;  %v630_v32 = vpop.f32.mrf.mxu2  ;;  %v670_v33 = vpop.f32.mrf.mxu3 }
  0xd9   : > { %829 = vst.msk [vmem:[%s1301_s30 + $0x38] sm:$0xff] %vm821_vm2, %v764_v30  ;;  %v631_v34 = vadd.f32 %v1293_v38, %v630_v32  ;;  %v671_v35 = vadd.f32 %v1293_v38, %v670_v33  ;;  %v553_v36 = vpop.f32.mrf.mxu0  ;;  %v593_v37 = vpop.f32.mrf.mxu1 }
  0xda   : > { %845 = vst.msk [vmem:[%s1301_s30 + $0xb8] sm:$0xff] %vm821_vm2, %v780_v31  ;;  %v554_v39 = vadd.f32 %v1293_v38, %v553_v36  ;;  %v594_v40 = vadd.f32 %v1293_v38, %v593_v37 }
  0xdb   : > { %v732_v41 = vmul.f32 0.2, %v631_v34  ;;  %v748_v42 = vmul.f32 0.2, %v671_v35 }
  0xdc   : > { %v701_v43 = vmul.f32 0.2, %v554_v39  ;;  %v717_v44 = vmul.f32 0.2, %v594_v40 }
  0xdd   : > { %v796_v45 = vmax.f32 %v631_v34, %v732_v41  ;;  %v812_v46 = vmax.f32 %v671_v35, %v748_v42 }
  0xde   : > { %v765_v47 = vmax.f32 %v554_v39, %v701_v43  ;;  %v781_v48 = vmax.f32 %v594_v40, %v717_v44 }
  0xdf   : > { %861 = vst.msk [vmem:[%s1301_s30 + $0x138] sm:$0xff] %vm821_vm2, %v796_v45 }
  0xe0   : > { %877 = vst.msk [vmem:[%s1301_s30 + $0x1b8] sm:$0xff] %vm821_vm2, %v812_v46  ;;  %v633_v49 = vpop.f32.mrf.mxu2  ;;  %v673_v50 = vpop.f32.mrf.mxu3 }
  0xe1   : > { %830 = vst.msk [vmem:[%s1301_s30 + $0x40] sm:$0xff] %vm821_vm2, %v765_v47  ;;  %v634_v51 = vadd.f32 %v1293_v38, %v633_v49  ;;  %v674_v52 = vadd.f32 %v1293_v38, %v673_v50  ;;  %v555_v53 = vpop.f32.mrf.mxu0  ;;  %v595_v54 = vpop.f32.mrf.mxu1 }
  0xe2   : > { %846 = vst.msk [vmem:[%s1301_s30 + $0xc0] sm:$0xff] %vm821_vm2, %v781_v48  ;;  %v556_v55 = vadd.f32 %v1293_v38, %v555_v53  ;;  %v596_v56 = vadd.f32 %v1293_v38, %v595_v54 }
  0xe3   : > { %v733_v57 = vmul.f32 0.2, %v634_v51  ;;  %v749_v58 = vmul.f32 0.2, %v674_v52 }
  0xe4   : > { %v702_v59 = vmul.f32 0.2, %v556_v55  ;;  %v718_v60 = vmul.f32 0.2, %v596_v56 }
  0xe5   : > { %v797_v61 = vmax.f32 %v634_v51, %v733_v57  ;;  %v813_v62 = vmax.f32 %v674_v52, %v749_v58 }
  0xe6   : > { %v766_v63 = vmax.f32 %v556_v55, %v702_v59  ;;  %v782_v0 = vmax.f32 %v596_v56, %v718_v60 }
  0xe7   : > { %862 = vst.msk [vmem:[%s1301_s30 + $0x140] sm:$0xff] %vm821_vm2, %v797_v61 }
  0xe8   : > { %878 = vst.msk [vmem:[%s1301_s30 + $0x1c0] sm:$0xff] %vm821_vm2, %v813_v62  ;;  %v635_v1 = vpop.f32.mrf.mxu2  ;;  %v675_v2 = vpop.f32.mrf.mxu3 }
  0xe9   : > { %831 = vst.msk [vmem:[%s1301_s30 + $0x48] sm:$0xff] %vm821_vm2, %v766_v63  ;;  %v636_v3 = vadd.f32 %v1293_v38, %v635_v1  ;;  %v676_v4 = vadd.f32 %v1293_v38, %v675_v2  ;;  %v558_v5 = vpop.f32.mrf.mxu0  ;;  %v598_v6 = vpop.f32.mrf.mxu1 }
  0xea   : > { %847 = vst.msk [vmem:[%s1301_s30 + $0xc8] sm:$0xff] %vm821_vm2, %v782_v0  ;;  %v559_v7 = vadd.f32 %v1293_v38, %v558_v5  ;;  %v599_v8 = vadd.f32 %v1293_v38, %v598_v6 }
  0xeb   : > { %v734_v9 = vmul.f32 0.2, %v636_v3  ;;  %v750_v10 = vmul.f32 0.2, %v676_v4 }
  0xec   : > { %v703_v11 = vmul.f32 0.2, %v559_v7  ;;  %v719_v12 = vmul.f32 0.2, %v599_v8 }
  0xed   : > { %v798_v13 = vmax.f32 %v636_v3, %v734_v9  ;;  %v814_v14 = vmax.f32 %v676_v4, %v750_v10 }
  0xee   : > { %v767_v15 = vmax.f32 %v559_v7, %v703_v11  ;;  %v783_v16 = vmax.f32 %v599_v8, %v719_v12 }
  0xef   : > { %863 = vst.msk [vmem:[%s1301_s30 + $0x148] sm:$0xff] %vm821_vm2, %v798_v13 }
  0xf0   : > { %879 = vst.msk [vmem:[%s1301_s30 + $0x1c8] sm:$0xff] %vm821_vm2, %v814_v14  ;;  %v638_v17 = vpop.f32.mrf.mxu2  ;;  %v678_v18 = vpop.f32.mrf.mxu3 }
  0xf1   : > { %832 = vst.msk [vmem:[%s1301_s30 + $0x50] sm:$0xff] %vm821_vm2, %v767_v15  ;;  %v639_v19 = vadd.f32 %v1293_v38, %v638_v17  ;;  %v679_v20 = vadd.f32 %v1293_v38, %v678_v18  ;;  %v560_v21 = vpop.f32.mrf.mxu0  ;;  %v600_v22 = vpop.f32.mrf.mxu1 }
  0xf2   : > { %848 = vst.msk [vmem:[%s1301_s30 + $0xd0] sm:$0xff] %vm821_vm2, %v783_v16  ;;  %v561_v23 = vadd.f32 %v1293_v38, %v560_v21  ;;  %v601_v24 = vadd.f32 %v1293_v38, %v600_v22 }
  0xf3   : > { %v735_v25 = vmul.f32 0.2, %v639_v19  ;;  %v751_v26 = vmul.f32 0.2, %v679_v20 }
  0xf4   : > { %v704_v27 = vmul.f32 0.2, %v561_v23  ;;  %v720_v28 = vmul.f32 0.2, %v601_v24 }
  0xf5   : > { %v799_v29 = vmax.f32 %v639_v19, %v735_v25  ;;  %v815_v30 = vmax.f32 %v679_v20, %v751_v26 }
  0xf6   : > { %v768_v31 = vmax.f32 %v561_v23, %v704_v27  ;;  %v784_v32 = vmax.f32 %v601_v24, %v720_v28 }
  0xf7   : > { %864 = vst.msk [vmem:[%s1301_s30 + $0x150] sm:$0xff] %vm821_vm2, %v799_v29 }
  0xf8   : > { %880 = vst.msk [vmem:[%s1301_s30 + $0x1d0] sm:$0xff] %vm821_vm2, %v815_v30  ;;  %v640_v33 = vpop.f32.mrf.mxu2  ;;  %v680_v34 = vpop.f32.mrf.mxu3 }
  0xf9   : > { %833 = vst.msk [vmem:[%s1301_s30 + $0x58] sm:$0xff] %vm821_vm2, %v768_v31  ;;  %v641_v35 = vadd.f32 %v1293_v38, %v640_v33  ;;  %v681_v36 = vadd.f32 %v1293_v38, %v680_v34  ;;  %v563_v37 = vpop.f32.mrf.mxu0  ;;  %v603_v39 = vpop.f32.mrf.mxu1 }
  0xfa   : > { %849 = vst.msk [vmem:[%s1301_s30 + $0xd8] sm:$0xff] %vm821_vm2, %v784_v32  ;;  %v564_v40 = vadd.f32 %v1293_v38, %v563_v37  ;;  %v604_v41 = vadd.f32 %v1293_v38, %v603_v39 }
  0xfb   : > { %v736_v42 = vmul.f32 0.2, %v641_v35  ;;  %v752_v43 = vmul.f32 0.2, %v681_v36 }
  0xfc   : > { %v705_v44 = vmul.f32 0.2, %v564_v40  ;;  %v721_v45 = vmul.f32 0.2, %v604_v41 }
  0xfd   : > { %v800_v46 = vmax.f32 %v641_v35, %v736_v42  ;;  %v816_v47 = vmax.f32 %v681_v36, %v752_v43 }
  0xfe   : > { %v769_v48 = vmax.f32 %v564_v40, %v705_v44  ;;  %v785_v49 = vmax.f32 %v604_v41, %v721_v45 }
  0xff   : > { %865 = vst.msk [vmem:[%s1301_s30 + $0x158] sm:$0xff] %vm821_vm2, %v800_v46 }
 0x100   : > { %881 = vst.msk [vmem:[%s1301_s30 + $0x1d8] sm:$0xff] %vm821_vm2, %v816_v47  ;;  %v643_v50 = vpop.f32.mrf.mxu2  ;;  %v683_v51 = vpop.f32.mrf.mxu3 }
 0x101   : > { %834 = vst.msk [vmem:[%s1301_s30 + $0x60] sm:$0xff] %vm821_vm2, %v769_v48  ;;  %v644_v52 = vadd.f32 %v1293_v38, %v643_v50  ;;  %v684_v53 = vadd.f32 %v1293_v38, %v683_v51  ;;  %v565_v54 = vpop.f32.mrf.mxu0  ;;  %v605_v55 = vpop.f32.mrf.mxu1 }
 0x102   : > { %850 = vst.msk [vmem:[%s1301_s30 + $0xe0] sm:$0xff] %vm821_vm2, %v785_v49  ;;  %v566_v56 = vadd.f32 %v1293_v38, %v565_v54  ;;  %v606_v57 = vadd.f32 %v1293_v38, %v605_v55 }
 0x103   : > { %v737_v58 = vmul.f32 0.2, %v644_v52  ;;  %v753_v59 = vmul.f32 0.2, %v684_v53 }
 0x104   : > { %v706_v60 = vmul.f32 0.2, %v566_v56  ;;  %v722_v61 = vmul.f32 0.2, %v606_v57 }
 0x105   : > { %v801_v62 = vmax.f32 %v644_v52, %v737_v58  ;;  %v817_v63 = vmax.f32 %v684_v53, %v753_v59 }
 0x106   : > { %v770_v0 = vmax.f32 %v566_v56, %v706_v60  ;;  %v786_v1 = vmax.f32 %v606_v57, %v722_v61 }
 0x107   : > { %866 = vst.msk [vmem:[%s1301_s30 + $0x160] sm:$0xff] %vm821_vm2, %v801_v62 }
 0x108   : > { %882 = vst.msk [vmem:[%s1301_s30 + $0x1e0] sm:$0xff] %vm821_vm2, %v817_v63  ;;  %v645_v2 = vpop.f32.mrf.mxu2  ;;  %v685_v3 = vpop.f32.mrf.mxu3 }
 0x109   : > { %835 = vst.msk [vmem:[%s1301_s30 + $0x68] sm:$0xff] %vm821_vm2, %v770_v0  ;;  %v646_v4 = vadd.f32 %v1293_v38, %v645_v2  ;;  %v686_v5 = vadd.f32 %v1293_v38, %v685_v3  ;;  %v568_v6 = vpop.f32.mrf.mxu0  ;;  %v608_v7 = vpop.f32.mrf.mxu1 }
 0x10a   : > { %851 = vst.msk [vmem:[%s1301_s30 + $0xe8] sm:$0xff] %vm821_vm2, %v786_v1  ;;  %v569_v8 = vadd.f32 %v1293_v38, %v568_v6  ;;  %v609_v9 = vadd.f32 %v1293_v38, %v608_v7 }
 0x10b   : > { %v738_v10 = vmul.f32 0.2, %v646_v4  ;;  %v754_v11 = vmul.f32 0.2, %v686_v5 }
 0x10c   : > { %v707_v12 = vmul.f32 0.2, %v569_v8  ;;  %v723_v13 = vmul.f32 0.2, %v609_v9 }
 0x10d   : > { %v802_v14 = vmax.f32 %v646_v4, %v738_v10  ;;  %v818_v15 = vmax.f32 %v686_v5, %v754_v11 }
 0x10e   : > { %v771_v16 = vmax.f32 %v569_v8, %v707_v12  ;;  %v787_v17 = vmax.f32 %v609_v9, %v723_v13 }
 0x10f   : > { %867 = vst.msk [vmem:[%s1301_s30 + $0x168] sm:$0xff] %vm821_vm2, %v802_v14 }
 0x110   : > { %883 = vst.msk [vmem:[%s1301_s30 + $0x1e8] sm:$0xff] %vm821_vm2, %v818_v15  ;;  %v648_v18 = vpop.f32.mrf.mxu2  ;;  %v688_v19 = vpop.f32.mrf.mxu3 }
 0x111   : > { %836 = vst.msk [vmem:[%s1301_s30 + $0x70] sm:$0xff] %vm821_vm2, %v771_v16  ;;  %v649_v20 = vadd.f32 %v1293_v38, %v648_v18  ;;  %v689_v21 = vadd.f32 %v1293_v38, %v688_v19  ;;  %v570_v22 = vpop.f32.mrf.mxu0  ;;  %v610_v23 = vpop.f32.mrf.mxu1 }
 0x112   : > { %852 = vst.msk [vmem:[%s1301_s30 + $0xf0] sm:$0xff] %vm821_vm2, %v787_v17  ;;  %v571_v24 = vadd.f32 %v1293_v38, %v570_v22  ;;  %v611_v25 = vadd.f32 %v1293_v38, %v610_v23 }
 0x113   : > { %v739_v26 = vmul.f32 0.2, %v649_v20  ;;  %v755_v27 = vmul.f32 0.2, %v689_v21 }
 0x114   : > { %v708_v28 = vmul.f32 0.2, %v571_v24  ;;  %v724_v29 = vmul.f32 0.2, %v611_v25 }
 0x115   : > { %v803_v30 = vmax.f32 %v649_v20, %v739_v26  ;;  %v819_v31 = vmax.f32 %v689_v21, %v755_v27 }
 0x116   : > { %v772_v32 = vmax.f32 %v571_v24, %v708_v28  ;;  %v788_v33 = vmax.f32 %v611_v25, %v724_v29 }
 0x117   : > { %868 = vst.msk [vmem:[%s1301_s30 + $0x170] sm:$0xff] %vm821_vm2, %v803_v30 }
 0x118   : > { %884 = vst.msk [vmem:[%s1301_s30 + $0x1f0] sm:$0xff] %vm821_vm2, %v819_v31  ;;  %v650_v34 = vpop.f32.mrf.mxu2  ;;  %v690_v35 = vpop.f32.mrf.mxu3 }
 0x119   : > { %837 = vst.msk [vmem:[%s1301_s30 + $0x78] sm:$0xff] %vm821_vm2, %v772_v32  ;;  %v651_v36 = vadd.f32 %v1293_v38, %v650_v34  ;;  %v691_v37 = vadd.f32 %v1293_v38, %v690_v35 }
 0x11a   : > { %853 = vst.msk [vmem:[%s1301_s30 + $0xf8] sm:$0xff] %vm821_vm2, %v788_v33 }
 0x11b   : > { %v740_v39 = vmul.f32 0.2, %v651_v36  ;;  %v756_v40 = vmul.f32 0.2, %v691_v37 }
 0x11d   : > { %v804_v41 = vmax.f32 %v651_v36, %v740_v39  ;;  %v820_v42 = vmax.f32 %v691_v37, %v756_v40 }
 0x11f   : > { %869 = vst.msk [vmem:[%s1301_s30 + $0x178] sm:$0xff] %vm821_vm2, %v804_v41 }
 0x120   : > { %885 = vst.msk [vmem:[%s1301_s30 + $0x1f8] sm:$0xff] %vm821_vm2, %v820_v42 }
 0x121 PF: > { %s13_s12 = sadd.s32 1, %s1179_s12  }
 0x122   : > { %p10_p4 = scmp.ge.s32.totalorder %s13_s12, 6  }
 0x124   :  { %12 = sbr.rel (!%p10_p4) target bundleno = 1 (0x1), region = 62 }

</bundles_post_ra>
